<compile_context>
chip_gen: v7x
topology: tpu7x:2x2x1
jax: 0.10.0
libtpu: 0.0.40
codegen_flags: <defaults>
</compile_context>

<pallas_src>
import functools

import jax
import jax.numpy as jnp
from jax import lax
from jax.experimental import pallas as pl
from jax.experimental.pallas import tpu as pltpu

EPS = float(jnp.finfo(jnp.float32).eps)
NLL_BALANCE = 0.5
LAMBDA_S = 1.0
LAMBDA_T0 = 1.0
LAMBDA_T1 = 1.0
FLOAT_MIN = -1.0 + EPS
FLOAT_MAX = 1.0 - EPS

# lane offsets inside the packed (B, 1, 128) output slab
_C0, _C1, _H, _LM, _LBR, _LBS = 0, 3, 6, 15, 16, 17
_PACK = 128


# --------------------------------------------------------------------------
# Fused kernel: point_projection + weighted-Kabsch stats + LightGlue
# 'bce_matchable' score-loss partials, one batch element per grid step.
# --------------------------------------------------------------------------
def _fused_loss_kernel(score_ref, p0a_ref, p1_ref, corr_ref, out_ref, *, M, N):
    score = score_ref[0]            # (M+1, N+1)
    p0a = p0a_ref[0]                # (M, 4)   [x, y, z, 1]
    p1 = p1_ref[0]                  # (N, 3)
    corr = corr_ref[0]              # (1, N) int32

    score_mn = score[:M, :N]        # start-0 slice of the resident tile

    # ---- point_projection (dustbin path) + transform statistics ------------
    # exp + column normalisation over the source dim.  Normalisation is applied
    # after the matmul (mathematically identical); the per-column sums
    # (weights_norm) fall out of the same MXU pass through the ones column.
    w = jnp.exp(score_mn)                                          # (M, N)
    stats = lax.dot_general(w, p0a, (((0,), (0,)), ((), ())),
                            preferred_element_type=jnp.float32)    # (N, 4)
    wnorm = stats[:, 3:4]                                          # (N, 1)
    p01 = stats[:, 0:3] / (wnorm + EPS)                            # (N, 3)

    # weighted rigid-transform statistics (per-reference weight = wnorm)
    pw_sum = jnp.sum(wnorm, keepdims=True)                         # (1, 1)
    pw_n = wnorm / (pw_sum + EPS)                                  # (N, 1)

    c0 = jnp.sum(p01 * pw_n, axis=0, keepdims=True)                # (1, 3)
    c1 = jnp.sum(p1 * pw_n, axis=0, keepdims=True)                 # (1, 3)
    src_c = p01 - c0
    tgt_c = p1 - c1
    h = lax.dot_general(src_c * pw_n, tgt_c, (((0,), (0,)), ((), ())),
                        preferred_element_type=jnp.float32)        # (3, 3)

    # ---- LightGlue-style 'bce_matchable' score-loss partials ----------------
    matches = corr > -1                                            # (1, N)
    num_matches = jnp.sum(matches.astype(jnp.float32), keepdims=True)  # (1, 1)

    m_iota = lax.broadcasted_iota(jnp.int32, (M, N), 0)
    onehot = jnp.logical_and(m_iota == corr, matches)              # (M, N) bool

    weight_match = jnp.where(num_matches > 0.0, 1.0 / num_matches, 0.0)
    loss_match = (jnp.sum(jnp.where(onehot, score_mn, 0.0), keepdims=True)
                  * weight_match)                                  # (1, 1)

    matched_src = jnp.max(jnp.where(onehot, 1.0, 0.0),
                          axis=1, keepdims=True)                   # (M, 1)
    unmatched_src = 1.0 - matched_src                              # (M, 1)
    unmatched_ref = jnp.where(corr == -1, 1.0, 0.0)                # (1, N)

    weight_m = 0.5 / jnp.maximum(M - num_matches, 1.0)             # (1, 1)
    weight_n = 0.5 / jnp.maximum(N - num_matches, 1.0)             # (1, 1)

    bin_col = score[:M, N:N + 1]        # (M, 1) source dustbin column
    bin_row = score[M:M + 1, :N]        # (1, N) reference dustbin row
    loss_bin_ref = jnp.sum(unmatched_src * bin_col, keepdims=True) * weight_m
    loss_bin_src = jnp.sum(unmatched_ref * bin_row, keepdims=True) * weight_n

    # ---- pack everything into one lane-dense (1, 128) output slab -----------
    out_ref[0] = jnp.zeros((1, _PACK), jnp.float32)
    out_ref[0, :, _C0:_C0 + 3] = c0
    out_ref[0, :, _C1:_C1 + 3] = c1
    out_ref[0, :, _H + 0:_H + 3] = h[0:1, :]
    out_ref[0, :, _H + 3:_H + 6] = h[1:2, :]
    out_ref[0, :, _H + 6:_H + 9] = h[2:3, :]
    out_ref[0, :, _LM:_LM + 1] = loss_match
    out_ref[0, :, _LBR:_LBR + 1] = loss_bin_ref
    out_ref[0, :, _LBS:_LBS + 1] = loss_bin_src


def fused_loss_stats(score, points_0_aug, points_1, corr3):
    """One pallas_call over grid=(B,) producing the packed (B, 1, 128) slab."""
    B, Mp1, Np1 = score.shape
    M, N = Mp1 - 1, Np1 - 1
    assert points_0_aug.shape == (B, M, 4)
    assert points_1.shape == (B, N, 3)

    kernel = functools.partial(_fused_loss_kernel, M=M, N=N)

    cost = pl.CostEstimate(
        flops=int(2 * B * M * N * 4 + 2 * B * N * 9 + 8 * B * M * N),
        transcendentals=int(B * M * N),
        bytes_accessed=int(4 * B * (Mp1 * Np1 + M * 4 + N * 3 + N + _PACK)),
    )

    grid_spec = pltpu.PrefetchScalarGridSpec(
        num_scalar_prefetch=0,
        grid=(B,),
        in_specs=[
            pl.BlockSpec((1, Mp1, Np1), lambda b: (b, 0, 0)),   # score (read once)
            pl.BlockSpec((1, M, 4), lambda b: (b, 0, 0)),       # [points_0 | 1]
            pl.BlockSpec((1, N, 3), lambda b: (b, 0, 0)),       # points_1
            pl.BlockSpec((1, 1, N), lambda b: (b, 0, 0)),       # correspondence
        ],
        out_specs=pl.BlockSpec((1, 1, _PACK), lambda b: (b, 0, 0)),
    )
    # TODO(synk): for huge M,N on v7x (64 MiB VMEM) tile the score over M with an
    # 'arbitrary' reduction axis; for B<2 on v7x split N over a second parallel
    # grid axis and combine partial sums in JAX to use both TensorCores.
    return pl.pallas_call(
        kernel,
        out_shape=jax.ShapeDtypeStruct((B, 1, _PACK), jnp.float32),
        grid_spec=grid_spec,
        compiler_params=pltpu.CompilerParams(
            dimension_semantics=("parallel",),
            vmem_limit_bytes=64 * 1024 * 1024,
        ),
        cost_estimate=cost,
    )(score, points_0_aug, points_1, corr3)


# --------------------------------------------------------------------------
# Plain-JAX glue (tiny 3x3 linear algebra + final combination)
# --------------------------------------------------------------------------
def finish_weighted_transform(c0, c1, h):
    """Weighted Kabsch finish: rotation via 3x3 SVD, translation from centroids."""
    # TODO(synk): 3x3 SVD / determinant have no Pallas equivalent; kept in plain JAX.
    u, _, vt = jnp.linalg.svd(h)
    v = jnp.swapaxes(vt, -1, -2)
    ut = jnp.swapaxes(u, -1, -2)
    det = jnp.linalg.det(jnp.matmul(v, ut))                                # (B,)
    d = jnp.stack([jnp.ones_like(det), jnp.ones_like(det), det], axis=-1)  # (B, 3)
    rot = jnp.matmul(v * d[:, None, :], ut)                                # (B, 3, 3)
    trans = c1 - jnp.einsum('bij,bj->bi', rot, c0)                         # (B, 3)
    return rot, trans


def transformation_loss(rot_gt, trans_gt, rot_est, trans_est):
    rot_res = jnp.matmul(jnp.swapaxes(rot_gt, 1, 2), rot_est)
    trace = jnp.einsum('bii->b', rot_res)
    rot_err = jnp.arccos(jnp.clip((trace - 1.0) / 2.0, FLOAT_MIN, FLOAT_MAX))
    trans_err = jnp.linalg.norm(trans_gt - trans_est, axis=1)
    return rot_err, trans_err


@jax.jit
def loss_forward(score, points_0, points_1, correspondence, rotation, translation):
    B, Mp1, Np1 = score.shape
    M, N = Mp1 - 1, Np1 - 1

    # append a ones column so the kernel's single MXU pass also yields the
    # column sums (weights_norm); tiny copy, negligible HBM traffic
    p0_aug = jnp.concatenate(
        [points_0, jnp.ones((B, M, 1), dtype=points_0.dtype)], axis=-1)
    corr3 = correspondence.reshape(B, 1, N).astype(jnp.int32)

    packed = fused_loss_stats(score, p0_aug, points_1, corr3)   # (B, 1, 128)

    c0 = packed[:, 0, _C0:_C0 + 3]                  # (B, 3)
    c1 = packed[:, 0, _C1:_C1 + 3]                  # (B, 3)
    h = packed[:, 0, _H:_H + 9].reshape(B, 3, 3)    # (B, 3, 3)
    loss_match = jnp.sum(packed[:, 0, _LM])
    loss_bin_ref = jnp.sum(packed[:, 0, _LBR])
    loss_bin_src = jnp.sum(packed[:, 0, _LBS])

    rot_est, trans_est = finish_weighted_transform(c0, c1, h)

    score_loss = (-NLL_BALANCE * loss_match
                  - (1.0 - NLL_BALANCE) * (loss_bin_ref + loss_bin_src))

    rot_err, trans_err = transformation_loss(rotation, translation, rot_est, trans_est)

    # defaults: use_score=True, use_transformation=False
    total = LAMBDA_S * score_loss
    return {
        'loss': total,
        's_loss': LAMBDA_S * score_loss,
        'r_loss': LAMBDA_T0 * rot_err,
        't_loss': LAMBDA_T1 * trans_err,
        'rotation': rot_est,
        'translation': trans_est,
    }


if __name__ == "__main__":
    key = jax.random.PRNGKey(0)
    B, M, N = 2, 8, 8
    k1, k2, k3, k4 = jax.random.split(key, 4)

    points_0 = jax.random.normal(k1, (B, M, 3), dtype=jnp.float32)

    # deterministic ground-truth rotations about z and small translations
    angles = jnp.array([0.3, -0.5], dtype=jnp.float32)
    c, s = jnp.cos(angles), jnp.sin(angles)
    z, o = jnp.zeros_like(c), jnp.ones_like(c)
    rotation = jnp.stack([
        jnp.stack([c, -s, z], axis=-1),
        jnp.stack([s, c, z], axis=-1),
        jnp.stack([z, z, o], axis=-1),
    ], axis=1)                                                   # (B, 3, 3)
    translation = 0.1 * jax.random.normal(k2, (B, 3), dtype=jnp.float32)

    points_1 = (jnp.einsum('bij,bnj->bni', rotation, points_0)
                + translation[:, None, :]
                + 0.01 * jax.random.normal(k3, (B, N, 3), dtype=jnp.float32))

    score = 0.1 * jax.random.normal(k4, (B, M + 1, N + 1), dtype=jnp.float32)
    correspondence = jnp.array([[0, 1, 2, -1, 4, -1, 6, 7],
                                [7, 6, -1, 4, 3, -1, 1, 0]], dtype=jnp.int32)

    out = loss_forward(score, points_0, points_1, correspondence, rotation, translation)
    jax.block_until_ready(out)
    print("KERNEL_OK")
</pallas_src>

<mosaic_0001>
module attributes {stable_mosaic.version = 11 : i64} {
  func.func @_fused_loss_kernel(%arg0: i32, %arg1: memref<1x9x9xf32, #tpu.memory_space<vmem>>, %arg2: memref<1x8x4xf32, #tpu.memory_space<vmem>>, %arg3: memref<1x8x3xf32, #tpu.memory_space<vmem>>, %arg4: memref<1x1x8xi32, #tpu.memory_space<vmem>>, %arg5: memref<1x1x128xf32, #tpu.memory_space<vmem>>) attributes {dimension_semantics = [#tpu.dimension_semantics<parallel>], iteration_bounds = array<i64: 2>, scalar_prefetch = 0 : i64, scratch_operands = 0 : i64, tpu.core_type = #tpu.core_type<tc>, window_params = [{transform_indices = @transform_0, window_bounds = array<i64: 1, 9, 9>}, {transform_indices = @transform_1, window_bounds = array<i64: 1, 8, 4>}, {transform_indices = @transform_2, window_bounds = array<i64: 1, 8, 3>}, {transform_indices = @transform_3, window_bounds = array<i64: 1, 1, 8>}, {transform_indices = @transform_4, window_bounds = array<i64: 1, 1, 128>}]} {
    %c0 = arith.constant 0 : index
    %c0_0 = arith.constant 0 : index
    %c0_1 = arith.constant 0 : index
    %0 = vector.load %arg1[%c0, %c0_0, %c0_1] : memref<1x9x9xf32, #tpu.memory_space<vmem>>, vector<1x9x9xf32>
    %1 = vector.shape_cast %0 : vector<1x9x9xf32> to vector<9x9xf32>
    %c0_2 = arith.constant 0 : index
    %c0_3 = arith.constant 0 : index
    %c0_4 = arith.constant 0 : index
    %2 = vector.load %arg2[%c0_2, %c0_3, %c0_4] : memref<1x8x4xf32, #tpu.memory_space<vmem>>, vector<1x8x4xf32>
    %3 = vector.shape_cast %2 : vector<1x8x4xf32> to vector<8x4xf32>
    %c0_5 = arith.constant 0 : index
    %c0_6 = arith.constant 0 : index
    %c0_7 = arith.constant 0 : index
    %4 = vector.load %arg3[%c0_5, %c0_6, %c0_7] : memref<1x8x3xf32, #tpu.memory_space<vmem>>, vector<1x8x3xf32>
    %5 = vector.shape_cast %4 : vector<1x8x3xf32> to vector<8x3xf32>
    %c0_8 = arith.constant 0 : index
    %c0_9 = arith.constant 0 : index
    %c0_10 = arith.constant 0 : index
    %6 = vector.load %arg4[%c0_8, %c0_9, %c0_10] : memref<1x1x8xi32, #tpu.memory_space<vmem>>, vector<1x1x8xi32>
    %7 = vector.shape_cast %6 : vector<1x1x8xi32> to vector<1x8xi32>
    %8 = vector.extract_strided_slice %1 {offsets = [0, 0], sizes = [8, 8], strides = [1, 1]} : vector<9x9xf32> to vector<8x8xf32>
    %9 = math.exp %8 : vector<8x8xf32>
    %cst = arith.constant dense<0.000000e+00> : vector<8x4xf32>
    %10 = tpu.matmul %9, %3, %cst {dimension_numbers = #tpu.dot_dimension_numbers<[0], [0], [1], [1], [0, 1, 1, 1], [], []>} : vector<8x8xf32>, vector<8x4xf32>, vector<8x4xf32> -> vector<8x4xf32>
    %11 = vector.extract_strided_slice %10 {offsets = [0, 3], sizes = [8, 1], strides = [1, 1]} : vector<8x4xf32> to vector<8x1xf32>
    %12 = vector.extract_strided_slice %10 {offsets = [0, 0], sizes = [8, 3], strides = [1, 1]} : vector<8x4xf32> to vector<8x3xf32>
    %cst_11 = arith.constant 1.1920929E-7 : f32
    %13 = vector.broadcast %cst_11 : f32 to vector<8x1xf32>
    %14 = arith.addf %11, %13 : vector<8x1xf32>
    %15 = vector.broadcast %14 : vector<8x1xf32> to vector<8x3xf32>
    %16 = arith.divf %12, %15 : vector<8x3xf32>
    %17 = vector.shape_cast %11 : vector<8x1xf32> to vector<1x8x1xf32>
    %cst_12 = arith.constant dense<0.000000e+00> : vector<1xf32>
    %18 = vector.multi_reduction <add>, %17, %cst_12 [1, 2] : vector<1x8x1xf32> to vector<1xf32>
    %19 = vector.shape_cast %18 : vector<1xf32> to vector<1x1x1xf32>
    %20 = vector.extract %19[0, 0, 0] : f32 from vector<1x1x1xf32>
    %21 = vector.broadcast %20 : f32 to vector<1x1xf32>
    %cst_13 = arith.constant 1.1920929E-7 : f32
    %22 = vector.broadcast %cst_13 : f32 to vector<1x1xf32>
    %23 = arith.addf %21, %22 : vector<1x1xf32>
    %24 = vector.broadcast %23 : vector<1x1xf32> to vector<8x1xf32>
    %25 = arith.divf %11, %24 : vector<8x1xf32>
    %26 = vector.broadcast %25 : vector<8x1xf32> to vector<8x3xf32>
    %27 = arith.mulf %16, %26 : vector<8x3xf32>
    %cst_14 = arith.constant dense<0.000000e+00> : vector<3xf32>
    %28 = vector.multi_reduction <add>, %27, %cst_14 [0] : vector<8x3xf32> to vector<3xf32>
    %29 = vector.shape_cast %28 : vector<3xf32> to vector<1x3xf32>
    %30 = vector.broadcast %25 : vector<8x1xf32> to vector<8x3xf32>
    %31 = arith.mulf %5, %30 : vector<8x3xf32>
    %cst_15 = arith.constant dense<0.000000e+00> : vector<3xf32>
    %32 = vector.multi_reduction <add>, %31, %cst_15 [0] : vector<8x3xf32> to vector<3xf32>
    %33 = vector.shape_cast %32 : vector<3xf32> to vector<1x3xf32>
    %34 = vector.broadcast %29 : vector<1x3xf32> to vector<8x3xf32>
    %35 = arith.subf %16, %34 : vector<8x3xf32>
    %36 = vector.broadcast %33 : vector<1x3xf32> to vector<8x3xf32>
    %37 = arith.subf %5, %36 : vector<8x3xf32>
    %38 = vector.broadcast %25 : vector<8x1xf32> to vector<8x3xf32>
    %39 = arith.mulf %35, %38 : vector<8x3xf32>
    %cst_16 = arith.constant dense<0.000000e+00> : vector<3x3xf32>
    %40 = tpu.matmul %39, %37, %cst_16 {dimension_numbers = #tpu.dot_dimension_numbers<[0], [0], [1], [1], [0, 1, 1, 1], [], []>} : vector<8x3xf32>, vector<8x3xf32>, vector<3x3xf32> -> vector<3x3xf32>
    %c-1_i32 = arith.constant -1 : i32
    %41 = vector.broadcast %c-1_i32 : i32 to vector<1x8xi32>
    %42 = arith.cmpi sgt, %7, %41 : vector<1x8xi32>
    %43 = arith.extui %42 : vector<1x8xi1> to vector<1x8xi32>
    %44 = arith.sitofp %43 : vector<1x8xi32> to vector<1x8xf32>
    %45 = vector.shape_cast %44 : vector<1x8xf32> to vector<1x1x8xf32>
    %cst_17 = arith.constant dense<0.000000e+00> : vector<1xf32>
    %46 = vector.multi_reduction <add>, %45, %cst_17 [1, 2] : vector<1x1x8xf32> to vector<1xf32>
    %47 = vector.shape_cast %46 : vector<1xf32> to vector<1x1x1xf32>
    %48 = vector.extract %47[0, 0, 0] : f32 from vector<1x1x1xf32>
    %49 = vector.broadcast %48 : f32 to vector<1x1xf32>
    %50 = tpu.iota {dimensions = array<i32: 0>} : vector<8x8xi32>
    %51 = vector.broadcast %7 : vector<1x8xi32> to vector<8x8xi32>
    %52 = arith.cmpi eq, %50, %51 : vector<8x8xi32>
    %53 = vector.broadcast %42 : vector<1x8xi1> to vector<8x8xi1>
    %54 = arith.andi %52, %53 : vector<8x8xi1>
    %cst_18 = arith.constant 0.000000e+00 : f32
    %55 = vector.broadcast %cst_18 : f32 to vector<1x1xf32>
    %56 = arith.cmpf ogt, %49, %55 : vector<1x1xf32>
    %cst_19 = arith.constant 1.000000e+00 : f32
    %57 = vector.broadcast %cst_19 : f32 to vector<1x1xf32>
    %58 = arith.divf %57, %49 : vector<1x1xf32>
    %cst_20 = arith.constant 0.000000e+00 : f32
    %59 = vector.broadcast %cst_20 : f32 to vector<1x1xf32>
    %60 = arith.select %56, %58, %59 : vector<1x1xi1>, vector<1x1xf32>
    %cst_21 = arith.constant 0.000000e+00 : f32
    %61 = vector.broadcast %cst_21 : f32 to vector<8x8xf32>
    %62 = arith.select %54, %8, %61 : vector<8x8xi1>, vector<8x8xf32>
    %63 = vector.shape_cast %62 : vector<8x8xf32> to vector<1x8x8xf32>
    %cst_22 = arith.constant dense<0.000000e+00> : vector<1xf32>
    %64 = vector.multi_reduction <add>, %63, %cst_22 [1, 2] : vector<1x8x8xf32> to vector<1xf32>
    %65 = vector.shape_cast %64 : vector<1xf32> to vector<1x1x1xf32>
    %66 = vector.extract %65[0, 0, 0] : f32 from vector<1x1x1xf32>
    %67 = vector.broadcast %66 : f32 to vector<1x1xf32>
    %68 = arith.mulf %67, %60 : vector<1x1xf32>
    %cst_23 = arith.constant 1.000000e+00 : f32
    %cst_24 = arith.constant 0.000000e+00 : f32
    %69 = vector.broadcast %cst_23 : f32 to vector<8x8xf32>
    %70 = vector.broadcast %cst_24 : f32 to vector<8x8xf32>
    %71 = arith.select %54, %69, %70 : vector<8x8xi1>, vector<8x8xf32>
    %cst_25 = arith.constant dense<0xFF800000> : vector<8xf32>
    %72 = vector.multi_reduction <maximumf>, %71, %cst_25 [1] : vector<8x8xf32> to vector<8xf32>
    %73 = vector.shape_cast %72 : vector<8xf32> to vector<8x1xf32>
    %cst_26 = arith.constant 1.000000e+00 : f32
    %74 = vector.broadcast %cst_26 : f32 to vector<8x1xf32>
    %75 = arith.subf %74, %73 : vector<8x1xf32>
    %c-1_i32_27 = arith.constant -1 : i32
    %76 = vector.broadcast %c-1_i32_27 : i32 to vector<1x8xi32>
    %77 = arith.cmpi eq, %7, %76 : vector<1x8xi32>
    %cst_28 = arith.constant 1.000000e+00 : f32
    %cst_29 = arith.constant 0.000000e+00 : f32
    %78 = vector.broadcast %cst_28 : f32 to vector<1x8xf32>
    %79 = vector.broadcast %cst_29 : f32 to vector<1x8xf32>
    %80 = arith.select %77, %78, %79 : vector<1x8xi1>, vector<1x8xf32>
    %cst_30 = arith.constant 8.000000e+00 : f32
    %81 = vector.broadcast %cst_30 : f32 to vector<1x1xf32>
    %82 = arith.subf %81, %49 : vector<1x1xf32>
    %cst_31 = arith.constant 1.000000e+00 : f32
    %83 = vector.broadcast %cst_31 : f32 to vector<1x1xf32>
    %84 = arith.maximumf %82, %83 : vector<1x1xf32>
    %cst_32 = arith.constant 5.000000e-01 : f32
    %85 = vector.broadcast %cst_32 : f32 to vector<1x1xf32>
    %86 = arith.divf %85, %84 : vector<1x1xf32>
    %cst_33 = arith.constant 8.000000e+00 : f32
    %87 = vector.broadcast %cst_33 : f32 to vector<1x1xf32>
    %88 = arith.subf %87, %49 : vector<1x1xf32>
    %cst_34 = arith.constant 1.000000e+00 : f32
    %89 = vector.broadcast %cst_34 : f32 to vector<1x1xf32>
    %90 = arith.maximumf %88, %89 : vector<1x1xf32>
    %cst_35 = arith.constant 5.000000e-01 : f32
    %91 = vector.broadcast %cst_35 : f32 to vector<1x1xf32>
    %92 = arith.divf %91, %90 : vector<1x1xf32>
    %93 = vector.extract_strided_slice %1 {offsets = [0, 8], sizes = [8, 1], strides = [1, 1]} : vector<9x9xf32> to vector<8x1xf32>
    %94 = vector.extract_strided_slice %1 {offsets = [8, 0], sizes = [1, 8], strides = [1, 1]} : vector<9x9xf32> to vector<1x8xf32>
    %95 = arith.mulf %75, %93 : vector<8x1xf32>
    %96 = vector.shape_cast %95 : vector<8x1xf32> to vector<1x8x1xf32>
    %cst_36 = arith.constant dense<0.000000e+00> : vector<1xf32>
    %97 = vector.multi_reduction <add>, %96, %cst_36 [1, 2] : vector<1x8x1xf32> to vector<1xf32>
    %98 = vector.shape_cast %97 : vector<1xf32> to vector<1x1x1xf32>
    %99 = vector.extract %98[0, 0, 0] : f32 from vector<1x1x1xf32>
    %100 = vector.broadcast %99 : f32 to vector<1x1xf32>
    %101 = arith.mulf %100, %86 : vector<1x1xf32>
    %102 = arith.mulf %80, %94 : vector<1x8xf32>
    %103 = vector.shape_cast %102 : vector<1x8xf32> to vector<1x1x8xf32>
    %cst_37 = arith.constant dense<0.000000e+00> : vector<1xf32>
    %104 = vector.multi_reduction <add>, %103, %cst_37 [1, 2] : vector<1x1x8xf32> to vector<1xf32>
    %105 = vector.shape_cast %104 : vector<1xf32> to vector<1x1x1xf32>
    %106 = vector.extract %105[0, 0, 0] : f32 from vector<1x1x1xf32>
    %107 = vector.broadcast %106 : f32 to vector<1x1xf32>
    %108 = arith.mulf %107, %92 : vector<1x1xf32>
    %cst_38 = arith.constant 0.000000e+00 : f32
    %109 = vector.broadcast %cst_38 : f32 to vector<1x128xf32>
    %c0_39 = arith.constant 0 : index
    %c0_40 = arith.constant 0 : index
    %c0_41 = arith.constant 0 : index
    %110 = vector.load %arg5[%c0_39, %c0_40, %c0_41] : memref<1x1x128xf32, #tpu.memory_space<vmem>>, vector<1x1x128xf32>
    %111 = vector.shape_cast %110 : vector<1x1x128xf32> to vector<1x128xf32>
    %112 = vector.shape_cast %109 : vector<1x128xf32> to vector<1x1x128xf32>
    tpu.vector_store %arg5[%c0_39, %c0_40, %c0_41], %112 {strides = array<i32>} : memref<1x1x128xf32, #tpu.memory_space<vmem>>, vector<1x1x128xf32>,
    %c0_42 = arith.constant 0 : index
    %c0_43 = arith.constant 0 : index
    %c0_44 = arith.constant 0 : index
    %113 = vector.load %arg5[%c0_42, %c0_43, %c0_44] : memref<1x1x128xf32, #tpu.memory_space<vmem>>, vector<1x1x3xf32>
    %114 = vector.shape_cast %113 : vector<1x1x3xf32> to vector<1x3xf32>
    %115 = vector.shape_cast %29 : vector<1x3xf32> to vector<1x1x3xf32>
    tpu.vector_store %arg5[%c0_42, %c0_43, %c0_44], %115 {strides = array<i32>} : memref<1x1x128xf32, #tpu.memory_space<vmem>>, vector<1x1x3xf32>,
    %c0_45 = arith.constant 0 : index
    %c0_46 = arith.constant 0 : index
    %c3 = arith.constant 3 : index
    %116 = vector.load %arg5[%c0_45, %c0_46, %c3] : memref<1x1x128xf32, #tpu.memory_space<vmem>>, vector<1x1x3xf32>
    %117 = vector.shape_cast %116 : vector<1x1x3xf32> to vector<1x3xf32>
    %118 = vector.shape_cast %33 : vector<1x3xf32> to vector<1x1x3xf32>
    tpu.vector_store %arg5[%c0_45, %c0_46, %c3], %118 {strides = array<i32>} : memref<1x1x128xf32, #tpu.memory_space<vmem>>, vector<1x1x3xf32>,
    %119 = vector.extract_strided_slice %40 {offsets = [0, 0], sizes = [1, 3], strides = [1, 1]} : vector<3x3xf32> to vector<1x3xf32>
    %c0_47 = arith.constant 0 : index
    %c0_48 = arith.constant 0 : index
    %c6 = arith.constant 6 : index
    %120 = vector.load %arg5[%c0_47, %c0_48, %c6] : memref<1x1x128xf32, #tpu.memory_space<vmem>>, vector<1x1x3xf32>
    %121 = vector.shape_cast %120 : vector<1x1x3xf32> to vector<1x3xf32>
    %122 = vector.shape_cast %119 : vector<1x3xf32> to vector<1x1x3xf32>
    tpu.vector_store %arg5[%c0_47, %c0_48, %c6], %122 {strides = array<i32>} : memref<1x1x128xf32, #tpu.memory_space<vmem>>, vector<1x1x3xf32>,
    %123 = vector.extract_strided_slice %40 {offsets = [1, 0], sizes = [1, 3], strides = [1, 1]} : vector<3x3xf32> to vector<1x3xf32>
    %c0_49 = arith.constant 0 : index
    %c0_50 = arith.constant 0 : index
    %c9 = arith.constant 9 : index
    %124 = vector.load %arg5[%c0_49, %c0_50, %c9] : memref<1x1x128xf32, #tpu.memory_space<vmem>>, vector<1x1x3xf32>
    %125 = vector.shape_cast %124 : vector<1x1x3xf32> to vector<1x3xf32>
    %126 = vector.shape_cast %123 : vector<1x3xf32> to vector<1x1x3xf32>
    tpu.vector_store %arg5[%c0_49, %c0_50, %c9], %126 {strides = array<i32>} : memref<1x1x128xf32, #tpu.memory_space<vmem>>, vector<1x1x3xf32>,
    %127 = vector.extract_strided_slice %40 {offsets = [2, 0], sizes = [1, 3], strides = [1, 1]} : vector<3x3xf32> to vector<1x3xf32>
    %c0_51 = arith.constant 0 : index
    %c0_52 = arith.constant 0 : index
    %c12 = arith.constant 12 : index
    %128 = vector.load %arg5[%c0_51, %c0_52, %c12] : memref<1x1x128xf32, #tpu.memory_space<vmem>>, vector<1x1x3xf32>
    %129 = vector.shape_cast %128 : vector<1x1x3xf32> to vector<1x3xf32>
    %130 = vector.shape_cast %127 : vector<1x3xf32> to vector<1x1x3xf32>
    tpu.vector_store %arg5[%c0_51, %c0_52, %c12], %130 {strides = array<i32>} : memref<1x1x128xf32, #tpu.memory_space<vmem>>, vector<1x1x3xf32>,
    %c0_53 = arith.constant 0 : index
    %c0_54 = arith.constant 0 : index
    %c15 = arith.constant 15 : index
    %131 = vector.load %arg5[%c0_53, %c0_54, %c15] : memref<1x1x128xf32, #tpu.memory_space<vmem>>, vector<1x1x1xf32>
    %132 = vector.shape_cast %131 : vector<1x1x1xf32> to vector<1x1xf32>
    %133 = vector.shape_cast %68 : vector<1x1xf32> to vector<1x1x1xf32>
    tpu.vector_store %arg5[%c0_53, %c0_54, %c15], %133 {strides = array<i32>} : memref<1x1x128xf32, #tpu.memory_space<vmem>>, vector<1x1x1xf32>,
    %c0_55 = arith.constant 0 : index
    %c0_56 = arith.constant 0 : index
    %c16 = arith.constant 16 : index
    %134 = vector.load %arg5[%c0_55, %c0_56, %c16] : memref<1x1x128xf32, #tpu.memory_space<vmem>>, vector<1x1x1xf32>
    %135 = vector.shape_cast %134 : vector<1x1x1xf32> to vector<1x1xf32>
    %136 = vector.shape_cast %101 : vector<1x1xf32> to vector<1x1x1xf32>
    tpu.vector_store %arg5[%c0_55, %c0_56, %c16], %136 {strides = array<i32>} : memref<1x1x128xf32, #tpu.memory_space<vmem>>, vector<1x1x1xf32>,
    %c0_57 = arith.constant 0 : index
    %c0_58 = arith.constant 0 : index
    %c17 = arith.constant 17 : index
    %137 = vector.load %arg5[%c0_57, %c0_58, %c17] : memref<1x1x128xf32, #tpu.memory_space<vmem>>, vector<1x1x1xf32>
    %138 = vector.shape_cast %137 : vector<1x1x1xf32> to vector<1x1xf32>
    %139 = vector.shape_cast %108 : vector<1x1xf32> to vector<1x1x1xf32>
    tpu.vector_store %arg5[%c0_57, %c0_58, %c17], %139 {strides = array<i32>} : memref<1x1x128xf32, #tpu.memory_space<vmem>>, vector<1x1x1xf32>,
    return
  }
  func.func @transform_0(%arg0: i32) -> (i32, i32, i32) {
    %c0_i32 = arith.constant 0 : i32
    %c0_i32_0 = arith.constant 0 : i32
    %c0_i32_1 = arith.constant 0 : i32
    return %arg0, %c0_i32, %c0_i32_0 : i32, i32, i32
  }
  func.func @transform_1(%arg0: i32) -> (i32, i32, i32) {
    %c0_i32 = arith.constant 0 : i32
    %c0_i32_0 = arith.constant 0 : i32
    %c0_i32_1 = arith.constant 0 : i32
    return %arg0, %c0_i32, %c0_i32_0 : i32, i32, i32
  }
  func.func @transform_2(%arg0: i32) -> (i32, i32, i32) {
    %c0_i32 = arith.constant 0 : i32
    %c0_i32_0 = arith.constant 0 : i32
    %c0_i32_1 = arith.constant 0 : i32
    return %arg0, %c0_i32, %c0_i32_0 : i32, i32, i32
  }
  func.func @transform_3(%arg0: i32) -> (i32, i32, i32) {
    %c0_i32 = arith.constant 0 : i32
    %c0_i32_0 = arith.constant 0 : i32
    %c0_i32_1 = arith.constant 0 : i32
    return %arg0, %c0_i32, %c0_i32_0 : i32, i32, i32
  }
  func.func @transform_4(%arg0: i32) -> (i32, i32, i32) {
    %c0_i32 = arith.constant 0 : i32
    %c0_i32_0 = arith.constant 0 : i32
    %c0_i32_1 = arith.constant 0 : i32
    return %arg0, %c0_i32, %c0_i32_0 : i32, i32, i32
  }
}

</mosaic_0001>

<bundles_post_ra>
// kernel: squeeze.64
= control target key start
LH: loop header
LB: loop body
LE: loop exit
PB: predicated region body
PF: predicated region fallthrough
CT: control target
= control target key end

     0   :  { %vm7_vm0 = vcmask 23552   ;;  %s36_s8 = smov 122   ;;  %s56_s0 = inlined_call_operand.vmem [shape: f32[2,9], index: 0, kind: input, shape index: {}]   ;;  %s57_s1 = inlined_call_operand.vmem [shape: f32[2,3,3], index: 1, kind: output, shape index: {}]  }
   0x1   :  { %v4_v0 = vld [vmem:[%s56_s0] sm:$0x3]  ;;  %s35_s0 = smov 125  }
   0x2   :  { %5 = vst [vmem:[#allocation1] sm:$0x3] %v4_v0 }
   0x9   :  { %v9_v1 = vld [vmem:[#allocation1] sm:$0x3]  }
   0xa   :  { %v6_v2 = vld [vmem:[#allocation1] sm:$0x3]   ;;  %10 = vrot.lane.b32.xlu0 %v9_v1, %s35_s0 }
   0xb   :  { %8 = vst.msk [vmem:[#allocation0] ss:$8 sm:$0x3] %vm7_vm0, %v6_v2   ;;  %v15_v3 = vld [vmem:[#allocation1] sm:$0x3]  }
   0xe   :  { %16 = vrot.lane.b32.xlu0 %v15_v3, %s36_s8 }
  0x7c   :  { %v11_v4 = vpop.permute.xlu0 %10  }
  0x7d   :  { %14 = vst.msk [vmem:[#allocation0 + $0x1] ss:$8 sm:$0x3] %vm7_vm0, %v11_v4  }
  0x80   :  { %v17_v5 = vpop.permute.xlu0 %16  }
  0x81   :  { %20 = vst.msk [vmem:[#allocation0 + $0x2] ss:$8 sm:$0x3] %vm7_vm0, %v17_v5  }
  0x88   :  { %v24_v6 = vld [vmem:[#allocation0] sm:$0xf]  ;;  %v28_v7 = vld [vmem:[#allocation0 + $0x8] sm:$0xf] }
  0x89   :  { %26 = vst [vmem:[%s57_s1] sm:$0xf] %v24_v6  ;;  %32 = vst [vmem:[%s57_s1 + $0x4] sm:$0xf] %v28_v7 }

// kernel: custom-call.57
= control target key start
LH: loop header
LB: loop body
LE: loop exit
PB: predicated region body
PF: predicated region fallthrough
CT: control target
= control target key end

     0   :  { %s645_s9 = smov 0   ;;  %s647_s10 = smov 0   ;;  %s795_s0 = inlined_call_operand.vmem [shape: f32[2,6,3], index: 0, kind: input, shape index: {}]   ;;  %s796_s1 = inlined_call_operand.vmem [shape: f32[2,6,3], index: 1, kind: output, shape index: {0}]   ;;  %s797_s2 = inlined_call_operand.vmem [shape: f32[2,3], index: 2, kind: output, shape index: {1}]  }
   0x1   :  { %s649_s11 = smov 0   ;;  %s651_s12 = smov 0  }
   0x2   :  { %s653_s13 = smov 0  }
   0x3 LB: > { %s28_s14 = sadd.s32 1, %s618_s12  ;;  %s500_s15 = sadd.s32 4294967295, %s622_s13   ;;  %s622_s13 = sphi %s653_s13, %s9_s13   ;;  %s618_s12 = sphi %s651_s12, %s804_s12   ;;  %s614_s11 = sphi %s649_s11, %s803_s11   ;;  %s610_s10 = sphi %s647_s10, %s802_s10   ;;  %s606_s9 = sphi %s645_s9, %s801_s9  }
   0x4   : > { %p30_p0 = scmp.ge.s32.totalorder %s28_s14, 2  ;;  %s33_s16 = ssub.s32 0, %s618_s12 }
   0x5   : > { %s502_s17 = smin.u32 %s618_s12, %s33_s16  ;;  %p57_p1 = scmp.ne.s32.totalorder %s610_s10, %s606_s9 }
   0x6   : > { %s806_s14 = smov (%p30_p0, %s28_s14), 0  ;;  %s35_s18 = sshrl.u32 %s502_s17, 3 }
   0x7   : > { %s39_s19 = ssub.s32 0, %s806_s14  ;;  %p58_p2 = scmp.eq.s32.totalorder %s500_s15, 1 }
   0x8   : > { %s503_s20 = smin.u32 %s39_s19, %s806_s14  ;;  %s47_s24 = sadd.s32 1, %s610_s10 }
   0x9   : > { %s41_s21 = sshrl.u32 %s503_s20, 3  ;;  %p680_p3 = por %p58_p2, %p57_p1 }
   0xa   : > { %s44_s23 = ssub.s32 %s35_s18, %s41_s21  ;;  %p505_p5 = scmp.ge.s32.totalorder %s622_s13, 2 }
   0xb   : > { %p45_p4 = scmp.eq.s32.totalorder %s44_s23, 0  ;;  %s82_s26 = sand.u32 (!%p505_p5), 1, %s622_s13  }
   0xc   : > { %80 = sbr.rel (%p505_p5) target bundleno = 19 (0x13), region = 16  ;;  %s507_s27 = sshll.u32 (!%p505_p5), %s618_s12, 3 }
   0xd   : > { %s686_s25 = scalar_select %p45_p4, %s610_s10, %s47_s24  }
   0xe   : > { %s506_s28 = sshll.u32 (!%p505_p5), %s82_s26, 3  ;;  %s88_s3 = scalar_lea.vmem (!%p505_p5), %s795_s0, %s507_s27 }
   0xf   : > { %v116_v0 = vld [vmem:[%s88_s3] sm:$0xff] (!%p505_p5)  ;;  %s84_s4 = scalar_lea.vmem (!%p505_p5), [#allocation0], %s506_s28 }
  0x10   : > { %117 = vst [vmem:[%s84_s4] sm:$0xff] (!%p505_p5), %v116_v0 }
  0x13 PF: > { %p508_p6 = scmp.ge.s32.totalorder %s622_s13, 1  ;;  %p122_p7 = scmp.lt.s32.totalorder %s622_s13, 3 }
  0x15   : > { %p123_p8 = pnand %p508_p6, %p122_p7 }
  0x17   : > { %126 = sbr.rel (%p123_p8) target bundleno = 330 (0x14a), region = 54 }
  0x1e   : > { %s129_s5 = sand.u32 1, %s500_s15   ;;  %s143_s6 = sand.u32 1, %s606_s9   ;;  %v628_v2 = vmov 0.0  }
  0x1f   : > { %s509_s7 = sshll.u32 %s129_s5, 3  ;;  %s697_s8 = sshll.u32 %s143_s6, 1 }
  0x20   : > { %s152_s16 = sand.u32 7, %s614_s11   ;;  %s131_s17 = scalar_lea.vmem [#allocation0], %s509_s7 }
  0x21   : > { %v154_v1 = vld [vmem:[%s131_s17] sm:$0xff]  ;;  %s700_s18 = scalar_lea.vmem [#allocation1], %s509_s7  ;;  %s703_s19 = scalar_lea.vmem [#allocation2], %s152_s16 }
  0x22   : > { %155 = vst [vmem:[%s700_s18] sm:$0xff] %v154_v1  ;;  %156 = vst [vmem:[%s703_s19] sm:$0x1] %v628_v2  ;;  %s145_s15 = scalar_lea.vmem [#allocation3], %s697_s8  ;;  %s707_s20 = smov 0  }
  0x23 LB: >> { %v164_v3 = vlaneseq  ;;  %v716_v5 = vstv %s626_s20  ;;  %s191_s9 = scalar_lea.vmem %s700_s18, %s626_s20 [#allocation1]  ;;  %s249_s21 = scalar_lea.vmem [#allocation4], %s626_s20  ;;  %v629_v59 = vmov 1.0   ;;  %s626_s20 = sphi %s707_s20, %s162_s20  }
  0x24   : >> { %s266_s23 = smov [#allocation4] }
  0x25   : >> { %v713_v4 = vshrl.u32 %v164_v3, 7  ;;  %v243_v48 = vand.u32 127, %v164_v3 }
  0x27   : >> { %vm168_vm0 = vcmp.gt.s32.totalorder %v713_v4, %v716_v5  ;;  %vm169_vm1 = vcmp.lt.s32.totalorder %v713_v4, 6  ;;  %v230_v4 = vmov %v713_v4  ;;  %vm734_vm12 = vcmp.eq.s32.totalorder %v243_v48, %v716_v5 }
  0x28   : >> { %vm170_vm2 = vmand %vm168_vm0, %vm169_vm1  ;;  %vm234_vm9 = vcmp.gt.s32.totalorder %v230_v4, %v716_v5  ;;  %vm235_vm10 = vcmp.lt.s32.totalorder %v230_v4, 6  ;;  %v269_v4 = vmov %v713_v4  ;;  %vm295_vm15 = vcmp.gt.s32.totalorder %v243_v48, %v716_v5 }
  0x29   : >> { %v163_v6 = vld [vmem:[%s700_s18] sm:$0xff]  ;;  %v192_v15 = vld [vmem:[%s191_s9] ss:$0 sm:$0xff]  ;;  %s227_s18 = smov %s700_s18  ;;  %vm236_vm11 = vmand %vm234_vm9, %vm235_vm10  ;;  %vm274_vm13 = vcmp.lt.s32.totalorder %v269_v4, 6  ;;  %v286_v4 = vmov %v713_v4 }
  0x2a   : >> { %v171_v7 = vsel %vm170_vm2, %v163_v6, 0.0  ;;  %v193_v16 = vand.u32 2147483647, %v192_v15  ;;  %vm218_vm8 = vcmp.lt.f32.partialorder %v192_v15, 0.0  ;;  %v231_v45 = vld [vmem:[%s227_s18] sm:$0xff]  ;;  %s265_s18 = smov %s700_s18  ;;  %vm303_vm14 = vcmp.ge.s32.totalorder %v286_v4, %v716_v5 }
  0x2b   : >> { %v172_v8 = vmul.f32 %v171_v7, %v171_v7  ;;  %v237_v49 = vsel %vm236_vm11, %v231_v45, 0.0  ;;  %v262_v60 = vld [vmem:[%s703_s19] ss:$0 sm:$0xff]  ;;  %vm304_vm0 = vmand %vm734_vm12, %vm303_vm14 }
  0x2c   : >> { %v194_v21 = vmax.f32 %v193_v16, 0.0  ;;  %v272_v63 = vld [vmem:[%s265_s18] sm:$0xff]  ;;  %s282_s18 = smov %s265_s18 }
  0x2d   : >> { %v173_v9 = vrot.slane %v172_v8, 4  ;;  %s307_s24 = scalar_lea.vmem %s282_s18, %s626_s20  ;;  %s162_s20 = sadd.s32 1, %s626_s20  }
  0x2e   : >> { %p159_p9 = scmp.ge.s32.totalorder %s162_s20, 3  }
  0x2f   : >> { %v174_v10 = vadd.f32 %v173_v9, %v172_v8  ;;  %s515_s26 = sshll.u32 (%p159_p9), %s614_s11, 3 }
  0x30   : > { %s332_s29 = scalar_lea.vmem (%p159_p9), %s796_s1, %s515_s26 }
  0x31   : >> { %v175_v11 = vrot.slane %v174_v10, 2 }
  0x33   : >> { %v176_v12 = vadd.f32 %v175_v11, %v174_v10 }
  0x35   : >> { %v177_v13 = vrot.slane %v176_v12, 1 }
  0x37   : >> { %v178_v14 = vadd.f32 %v177_v13, %v176_v12  ;;  %v293_v13 = vld [vmem:[%s282_s18] sm:$0xff] }
  0x39   : >> { %570 = vrsqrt.f32 %v178_v14  ;;  %vm181_vm3 = vcmp.eq.f32.partialorder %v178_v14, inf  ;;  %v184_v18 = vand.u32 2147483648, %v178_v14  ;;  %vm183_vm4 = vcmp.eq.f32.partialorder %v178_v14, 0.0 }
  0x43   : >> { %v571_v17 = vpop.eup %570 }
  0x44   : >> { %v180_v19 = vmul.f32 %v571_v17, %v178_v14 }
  0x46   : >> { %v182_v20 = vsel %vm181_vm3, %v178_v14, %v180_v19 }
  0x47   : >> { %v185_v22 = vsel %vm183_vm4, %v184_v18, %v182_v20 }
  0x48   : >> { %v195_v23 = vand.u32 2147483647, %v185_v22 }
  0x4a   : >> { %v196_v24 = vmax.f32 %v194_v21, %v195_v23 }
  0x4c   : >> { %572 = vrcp.f32 %v196_v24  ;;  %vm208_vm7 = vcmp.eq.f32.partialorder %v196_v24, 0.0 }
  0x56   : >> { %v573_v25 = vpop.eup %572 }
  0x57   : >> { %v198_v26 = vmul.f32 %v573_v25, %v193_v16  ;;  %v201_v27 = vmul.f32 0.0, %v573_v25  ;;  %v205_v28 = vmul.f32 %v573_v25, %v195_v23 }
  0x59   : >> { %v199_v29 = vmul.f32 %v198_v26, %v198_v26  ;;  %v202_v30 = vmul.f32 %v201_v27, %v201_v27  ;;  %v206_v31 = vmul.f32 %v205_v28, %v205_v28 }
  0x5b   : >> { %v203_v32 = vadd.f32 %v202_v30, %v199_v29 }
  0x5d   : >> { %v207_v33 = vadd.f32 %v206_v31, %v203_v32 }
  0x5f   : >> { %574 = vrsqrt.f32 %v207_v33  ;;  %vm211_vm5 = vcmp.eq.f32.partialorder %v207_v33, inf  ;;  %v214_v35 = vand.u32 2147483648, %v207_v33  ;;  %vm213_vm6 = vcmp.eq.f32.partialorder %v207_v33, 0.0 }
  0x69   : >> { %v575_v34 = vpop.eup %574 }
  0x6a   : >> { %v210_v36 = vmul.f32 %v575_v34, %v207_v33 }
  0x6c   : >> { %v212_v37 = vsel %vm211_vm5, %v207_v33, %v210_v36 }
  0x6d   : >> { %v215_v38 = vsel %vm213_vm6, %v214_v35, %v212_v37 }
  0x6e   : >> { %v216_v39 = vmul.f32 %v215_v38, %v196_v24 }
  0x70   : >> { %v217_v40 = vsel %vm208_vm7, 0.0, %v216_v39 }
  0x71   : >> { %v219_v41 = vxor.u32 2147483648, %v217_v40 }
  0x73   : >> { %v220_v42 = vsel %vm218_vm8, %v217_v40, %v219_v41 }
  0x74   : >> { %v726_v43 = vsel %vm183_vm4, %v192_v15, %v220_v42  ;;  %576 = vrcp.f32 %v220_v42  ;;  %v221_v46 = vsub.f32 %v220_v42, %v192_v15 }
  0x75   : >> { %v226_v44 = vsub.f32 %v192_v15, %v726_v43 }
  0x77   : >> { %578 = vrcp.f32 %v226_v44 }
  0x7e   : >> { %v577_v47 = vpop.eup %576 }
  0x7f   : >> { %v223_v50 = vmul.f32 %v577_v47, %v221_v46 }
  0x81   : >> { %v579_v51 = vpop.eup %578  ;;  %v225_v55 = vsel %vm183_vm4, 0.0, %v223_v50 }
  0x82   : >> { %v239_v52 = vmul.f32 %v579_v51, %v237_v49  ;;  %v255_v57 = vsel %vm734_vm12, %v225_v55, 0.0 }
  0x84   : >> { %v240_v54 = vsel %vm183_vm4, 0.0, %v239_v52 }
  0x85   : >> { %v245_v56 = vsel %vm734_vm12, %v240_v54, 0.0 }
  0x86   : >> { %246 = vadd.xlane.f32.xlu0 %v245_v56 }
  0x8a   : >> { %256 = vadd.xlane.f32.xlu0 %v255_v57 }
 0x113   : >> { %v247_v58 = vpop.xlane.xlu0 %246 }
 0x114   : >> { %248 = vst [vmem:[#allocation4] sm:$0xff] %v247_v58 }
 0x115   : >> { %250 = vst [vmem:[%s249_s21] sm:$0x1] %v629_v59 }
 0x117   : >> { %v257_v61 = vpop.xlane.xlu0 %256 }
 0x118   : >> { %v263_v62 = vsel %vm734_vm12, %v257_v61, %v262_v60 }
 0x119   : >> { %264 = vst [vmem:[%s703_s19] sm:$0x1] %v263_v62 }
 0x11c   : >> { %v271_v0 = vld [vmem:[%s266_s23] sm:$0xff]  ;;  %s283_s23 = smov %s266_s23 }
 0x11d   : >> { %v273_v1 = vmul.f32 %v272_v63, %v271_v0  ;;  %v291_v12 = vld [vmem:[%s283_s23] sm:$0xff] }
 0x11f   : >> { %v275_v2 = vsel %vm274_vm13, %v273_v1, 0.0 }
 0x120   : >> { %v276_v3 = vrot.slane %v275_v2, 4  ;;  %v318_v4 = vld [vmem:[#allocation2] sm:$0x3] (%p159_p9) }
 0x121   : > { %320 = vst [vmem:[%s145_s15] sm:$0x3] (%p159_p9), %v318_v4 }
 0x122   : >> { %v277_v6 = vadd.f32 %v276_v3, %v275_v2 }
 0x124   : >> { %v278_v7 = vrot.slane %v277_v6, 2 }
 0x126   : >> { %v279_v8 = vadd.f32 %v278_v7, %v277_v6 }
 0x128   : >> { %v280_v9 = vrot.slane %v279_v8, 1 }
 0x12a   : >> { %v281_v10 = vadd.f32 %v280_v9, %v279_v8 }
 0x12c   : >> { %v287_v11 = vmul.f32 %v281_v10, %v257_v61 }
 0x12e   : >> { %v292_v14 = vmul.f32 %v291_v12, %v287_v11 }
 0x130   : >> { %v296_v15 = vsub.f32 %v293_v13, %v292_v14 }
 0x132   : >> { %v297_v16 = vsel %vm295_vm15, %v296_v15, %v293_v13 }
 0x133   : >> { %v305_v17 = vsel %vm304_vm0, %v291_v12, %v297_v16 }
 0x134   : >> { %306 = vst [vmem:[%s282_s18] sm:$0xff] %v305_v17 }
 0x137   : > { %161 = sbr.rel (!%p159_p9) target bundleno = 35 (0x23), region = 175 }
 0x13b   : >> { %v308_v18 = vld [vmem:[%s307_s24] ss:$0 sm:$0xff] }
 0x13c   : >> { %v313_v19 = vsel %vm734_vm12, %v726_v43, %v308_v18 }
 0x13d   : >> { %314 = vst [vmem:[%s307_s24] sm:$0x1] %v313_v19 }
 0x13e   : > { %p368_p10 = scmp.lt.s32.totalorder (%p680_p3), %s614_s11, 0  ;;  %s369_s30 = ssub.s32 (%p680_p3), 0, %s614_s11  ;;  %v391_v20 = vld [vmem:[%s145_s15] sm:$0x3] (%p680_p3) }
 0x13f   : > { %367 = sbr.rel (!%p680_p3) target bundleno = 330 (0x14a), region = 99  ;;  %s516_s3 = smin.u32 (%p680_p3), %s614_s11, %s369_s30 }
 0x140   : > { %s371_s4 = sshrl.u32 (%p680_p3), %s516_s3, 3 }
 0x141   : > { %s372_s5 = ssub.s32 (%p680_p3), 0, %s371_s4 }
 0x144   : > { %v360_v5 = vld [vmem:[%s700_s18] sm:$0xff] }
 0x145   : > { %361 = vst [vmem:[%s332_s29] sm:$0xff] %v360_v5 }
 0x146   : > { %s808_s5 = smov (!%p368_p10, %s372_s5), %s371_s4 }
 0x147   : > { %s517_s6 = sshll.u32 %s808_s5, 1 }
 0x148   : > { %s375_s17 = scalar_lea.vmem %s797_s2, %s517_s6 }
 0x149   : > { %392 = vst [vmem:[%s375_s17] sm:$0x3] %v391_v20 }
 0x14a PF: > { %s9_s13 = sadd.s32 1, %s622_s13   ;;  %s801_s9 = smov %s610_s10 }
 0x14b   : > { %p6_p11 = scmp.ge.s32.totalorder %s9_s13, 4   ;;  %s802_s10 = smov %s686_s25 }
 0x14c   : > { %s803_s11 = smov %s618_s12  ;;  %s804_s12 = smov %s806_s14 }
 0x14d   :  { %8 = sbr.rel (!%p6_p11) target bundleno = 3 (0x3), region = 186 }

// kernel: custom-call.58
= control target key start
LH: loop header
LB: loop body
LE: loop exit
PB: predicated region body
PF: predicated region fallthrough
CT: control target
= control target key end

     0   :  { %s236_s6 = smov 0   ;;  %s263_s0 = inlined_call_operand.vmem [shape: f32[2,3,3], index: 0, kind: input, shape index: {}]   ;;  %s264_s1 = inlined_call_operand.vmem [shape: f32[2,3,3], index: 1, kind: output, shape index: {}]  }
   0x1 LB: > { %s198_s7 = sadd.s32 4294967295, %s224_s6   ;;  %p200_p0 = scmp.ge.s32.totalorder %s224_s6, 2  ;;  %s224_s6 = sphi %s236_s6, %s7_s6  }
   0x2   : > { %s23_s8 = sand.u32 (!%p200_p0), 1, %s224_s6   ;;  %s202_s9 = sshll.u32 (!%p200_p0), %s224_s6, 2 }
   0x3   : > { %21 = sbr.rel (%p200_p0) target bundleno = 10 (0xa), region = 16  ;;  %s201_s10 = sshll.u32 (!%p200_p0), %s23_s8, 2 }
   0x4   : > { %s27_s13 = scalar_lea.vmem (!%p200_p0), %s263_s0, %s202_s9  ;;  %s25_s14 = scalar_lea.vmem (!%p200_p0), [#allocation1], %s201_s10 }
   0x5   : > { %v43_v0 = vld [vmem:[%s27_s13] sm:$0xf] (!%p200_p0) }
   0x6   : > { %44 = vst [vmem:[%s25_s14] sm:$0xf] (!%p200_p0), %v43_v0 }
   0xa PF: > { %p203_p1 = scmp.ge.s32.totalorder %s224_s6, 1  ;;  %p60_p2 = scmp.lt.s32.totalorder %s224_s6, 3 }
   0xc   : > { %p61_p3 = pnand %p203_p1, %p60_p2 }
   0xd   : > { %s252_s15 = sand.u32 (!%p61_p3), 1, %s198_s7   ;;  %v82_v1 = vlaneseq (!%p61_p3)  ;;  %vm96_vm1 = vcmask (!%p61_p3), 23552   ;;  %s207_s19 = sshll.u32 (!%p61_p3), %s198_s7, 2 }
   0xe   : > { %64 = sbr.rel (%p61_p3) target bundleno = 334 (0x14e), region = 50  ;;  %s204_s16 = sshll.u32 (!%p61_p3), %s252_s15, 2 }
   0xf   : > { %s73_s17 = scalar_lea.vmem (!%p61_p3), [#allocation1], %s204_s16  ;;  %v83_v3 = vand.u32 (!%p61_p3), 127, %v82_v1  ;;  %v85_v4 = vshrl.u32 (!%p61_p3), %v82_v1, 7  ;;  %s77_s18 = scalar_lea.vmem (!%p61_p3), [#allocation3], %s204_s16 }
  0x10   : > { %v80_v2 = vld [vmem:[%s73_s17] sm:$0xf] (!%p61_p3)  ;;  %s128_s22 = scalar_lea.vmem (!%p61_p3), %s264_s1, %s207_s19 }
  0x11   : > { %81 = vst [vmem:[#allocation0] sm:$0xf] (!%p61_p3), %v80_v2  ;;  %vm91_vm0 = vcmp.eq.s32.totalorder (!%p61_p3), %v83_v3, 0  ;;  %vm87_vm2 = vcmp.eq.s32.totalorder (!%p61_p3), %v83_v3, %v85_v4  ;;  %vm100_vm3 = vcmp.eq.s32.totalorder (!%p61_p3), %v83_v3, 1  ;;  %vm111_vm4 = vcmp.eq.s32.totalorder (!%p61_p3), %v83_v3, 2 }
  0x18   : > { %v88_v5 = vld [vmem:[#allocation0] sm:$0xff] }
  0x19   : > { %v95_v6 = vld [vmem:[#allocation0 + $0x1] ss:$0 sm:$0xff]  ;;  %v92_v7 = vsel %vm91_vm0, %v88_v5, 1.0  ;;  %v106_v11 = vld [vmem:[#allocation0 + $0x2] ss:$0 sm:$0xff] }
  0x1a   : > { %v97_v8 = vsel %vm96_vm1, %v95_v6, 0.0  ;;  %v93_v9 = vsel %vm87_vm2, %v92_v7, 0.0  ;;  %v108_v12 = vsel %vm96_vm1, %v106_v11, 0.0 }
  0x1b   : > { %v101_v10 = vmul.f32 %v97_v8, %v93_v9 }
  0x1d   : > { %102 = vadd.xlane.f32.xlu0 %v101_v10 }
  0xaa   : > { %v103_v13 = vpop.xlane.xlu0 %102 }
  0xab   : > { %v104_v14 = vsel %vm100_vm3, %v103_v13, %v93_v9 }
  0xac   : > { %v112_v15 = vmul.f32 %v108_v12, %v104_v14 }
  0xae   : > { %113 = vadd.xlane.f32.xlu0 %v112_v15 }
 0x13b   : > { %v114_v16 = vpop.xlane.xlu0 %113 }
 0x13c   : > { %v115_v17 = vsel %vm111_vm4, %v114_v16, %v104_v14 }
 0x13d   : > { %116 = vst [vmem:[#allocation2] sm:$0xff] %v115_v17 }
 0x144   : > { %v120_v18 = vld [vmem:[#allocation2] sm:$0xf] }
 0x145   : > { %122 = vst [vmem:[%s77_s18] sm:$0xf] %v120_v18 }
 0x14c   : > { %v144_v19 = vld [vmem:[%s77_s18] sm:$0xf] }
 0x14d   : > { %145 = vst [vmem:[%s128_s22] sm:$0xf] %v144_v19 }
 0x14e PF: > { %s7_s6 = sadd.s32 1, %s224_s6  }
 0x14f   : > { %p4_p4 = scmp.ge.s32.totalorder %s7_s6, 4  }
 0x151   :  { %6 = sbr.rel (!%p4_p4) target bundleno = 1 (0x1), region = 112 }

// kernel: custom-call.50
= control target key start
LH: loop header
LB: loop body
LE: loop exit
PB: predicated region body
PF: predicated region fallthrough
CT: control target
= control target key end

     0   :  { %s6_s0 = inlined_call_operand.hbm [shape: pred[2], index: 0, kind: output, shape index: {}]  }

// kernel: custom-call.55
= control target key start
LH: loop header
LB: loop body
LE: loop exit
PB: predicated region body
PF: predicated region fallthrough
CT: control target
= control target key end

     0   :  { %s343_s6 = smov 0   ;;  %s345_s7 = smov 0   ;;  %s390_s0 = inlined_call_operand.vmem [shape: f32[2,3,3], index: 0, kind: input, shape index: {}]   ;;  %s391_s1 = inlined_call_operand.vmem [shape: f32[2,3,3], index: 1, kind: output, shape index: {}]  }
   0x1   :  { %s347_s8 = smov 0  }
   0x2 LB: > { %s265_s9 = sadd.s32 4294967295, %s330_s8   ;;  %s26_s10 = sadd.s32 1, %s326_s7  ;;  %s330_s8 = sphi %s347_s8, %s7_s8   ;;  %s326_s7 = sphi %s345_s7, %s393_s7   ;;  %s322_s6 = sphi %s343_s6, %s392_s6  }
   0x3   : > { %p28_p0 = scmp.ge.s32.totalorder %s26_s10, 2  ;;  %p267_p1 = scmp.ge.s32.totalorder %s330_s8, 2 }
   0x4   : > { %s42_s11 = sand.u32 (!%p267_p1), 1, %s330_s8   ;;  %s269_s12 = sshll.u32 (!%p267_p1), %s326_s7, 2 }
   0x5   : > { %s395_s10 = smov (%p28_p0, %s26_s10), 0  ;;  %40 = sbr.rel (%p267_p1) target bundleno = 12 (0xc), region = 16 }
   0x6   : > { %s268_s13 = sshll.u32 (!%p267_p1), %s42_s11, 2  ;;  %s48_s16 = scalar_lea.vmem (!%p267_p1), %s390_s0, %s269_s12 }
   0x7   : > { %v64_v0 = vld [vmem:[%s48_s16] sm:$0xf] (!%p267_p1)  ;;  %s44_s17 = scalar_lea.vmem (!%p267_p1), [#allocation1], %s268_s13 }
   0x8   : > { %65 = vst [vmem:[%s44_s17] sm:$0xf] (!%p267_p1), %v64_v0 }
   0xc PF: > { %p270_p2 = scmp.ge.s32.totalorder %s330_s8, 1  ;;  %p81_p3 = scmp.lt.s32.totalorder %s330_s8, 3 }
   0xe   : > { %p82_p4 = pnand %p270_p2, %p81_p3 }
   0xf   : > { %v332_v1 = vmov (!%p82_p4), 0.0   ;;  %s370_s18 = sand.u32 (!%p82_p4), 1, %s265_s9   ;;  %vm104_vm0 = vcmask (!%p82_p4), 7168   ;;  %vm122_vm1 = vcmask (!%p82_p4), 15368   ;;  %vm139_vm2 = vcmask (!%p82_p4), 1047553   ;;  %s274_s22 = sshll.u32 (!%p82_p4), %s322_s6, 2 }
  0x10   : > { %85 = sbr.rel (%p82_p4) target bundleno = 541 (0x21d), region = 50  ;;  %103 = vst [vmem:[#allocation2] sm:$0xff] (!%p82_p4), %v332_v1  ;;  %s271_s19 = sshll.u32 (!%p82_p4), %s370_s18, 2  ;;  %vm140_vm3 = vmand (!%p82_p4), %vm122_vm1, %vm139_vm2  ;;  %vm144_vm4 = vcmask (!%p82_p4), 23568   ;;  %vm161_vm5 = vcmask (!%p82_p4), 1047554  }
  0x11   : > { %s94_s20 = scalar_lea.vmem (!%p82_p4), [#allocation1], %s271_s19  ;;  %vm162_vm6 = vmand (!%p82_p4), %vm144_vm4, %vm161_vm5  ;;  %s98_s21 = scalar_lea.vmem (!%p82_p4), [#allocation3], %s271_s19 }
  0x12   : > { %v101_v5 = vld [vmem:[%s94_s20] sm:$0xf] (!%p82_p4)  ;;  %s179_s25 = scalar_lea.vmem (!%p82_p4), %s391_s1, %s274_s22 }
  0x13   : > { %102 = vst [vmem:[#allocation0] sm:$0xf] (!%p82_p4), %v101_v5 }
  0x17   : > { %v105_v2 = vld [vmem:[#allocation2] ss:$0 sm:$0xff] }
  0x18   : > { %v107_v3 = vmul.f32 %v105_v2, %v105_v2  ;;  %v114_v4 = vmul.f32 0.0, %v105_v2 }
  0x1a   : > { %108 = vadd.xlane.f32.xlu0 %v107_v3  ;;  %v106_v6 = vld [vmem:[#allocation0] ss:$0 sm:$0xff]  ;;  %v126_v18 = vld [vmem:[#allocation0 + $0x1] ss:$0 sm:$0xff]  ;;  %v148_v30 = vld [vmem:[#allocation0 + $0x2] ss:$0 sm:$0xff] }
  0x1b   : > { %v112_v10 = vld [vmem:[#allocation0] sm:$0xff] }
  0x1e   : > { %115 = vadd.xlane.f32.xlu0 %v114_v4 }
  0xa7   : > { %v109_v7 = vpop.xlane.xlu0 %108 }
  0xa8   : > { %v110_v8 = vsub.f32 %v106_v6, %v109_v7 }
  0xaa   : > { %302 = vrsqrt.f32 %v110_v8 }
  0xab   : > { %v116_v9 = vpop.xlane.xlu0 %115 }
  0xac   : > { %v117_v11 = vsub.f32 %v112_v10, %v116_v9 }
  0xb4   : > { %v303_v12 = vpop.eup %302 }
  0xb5   : > { %v118_v13 = vmul.f32 %v303_v12, %v117_v11 }
  0xb7   : > { %v119_v14 = vsel %vm104_vm0, %v118_v13, 0.0 }
  0xb8   : > { %121 = vst [vmem:[#allocation2] sm:$0xff] %v119_v14 }
  0xbf   : > { %v124_v15 = vld [vmem:[#allocation2 + $0x1] ss:$0 sm:$0xff] }
  0xc0   : > { %v127_v16 = vmul.f32 %v124_v15, %v124_v15  ;;  %v134_v17 = vmul.f32 %v124_v15, %v119_v14 }
  0xc2   : > { %128 = vadd.xlane.f32.xlu1 %v127_v16 }
  0xc6   : > { %135 = vadd.xlane.f32.xlu1 %v134_v17 }
 0x14f   : > { %v129_v19 = vpop.xlane.xlu1 %128 }
 0x150   : > { %v130_v20 = vsub.f32 %v126_v18, %v129_v19 }
 0x152   : > { %304 = vrsqrt.f32 %v130_v20 }
 0x153   : > { %v136_v21 = vpop.xlane.xlu1 %135 }
 0x154   : > { %v137_v22 = vsub.f32 %v112_v10, %v136_v21 }
 0x15c   : > { %v305_v23 = vpop.eup %304 }
 0x15d   : > { %v138_v24 = vmul.f32 %v305_v23, %v137_v22 }
 0x15f   : > { %v141_v25 = vsel %vm140_vm3, %v138_v24, 0.0 }
 0x160   : > { %v142_v26 = vadd.f32 %v141_v25, %v119_v14 }
 0x162   : > { %143 = vst [vmem:[#allocation2] sm:$0xff] %v142_v26 }
 0x169   : > { %v146_v27 = vld [vmem:[#allocation2 + $0x2] ss:$0 sm:$0xff] }
 0x16a   : > { %v156_v28 = vmul.f32 %v146_v27, %v142_v26  ;;  %v149_v29 = vmul.f32 %v146_v27, %v146_v27 }
 0x16c   : > { %157 = vadd.xlane.f32.xlu1 %v156_v28  ;;  %150 = vadd.xlane.f32.xlu0 %v149_v29 }
 0x1f9   : > { %v151_v31 = vpop.xlane.xlu0 %150  ;;  %v158_v33 = vpop.xlane.xlu1 %157 }
 0x1fa   : > { %v152_v32 = vsub.f32 %v148_v30, %v151_v31  ;;  %v159_v34 = vsub.f32 %v112_v10, %v158_v33 }
 0x1fc   : > { %306 = vrsqrt.f32 %v152_v32 }
 0x206   : > { %v307_v35 = vpop.eup %306 }
 0x207   : > { %v160_v36 = vmul.f32 %v307_v35, %v159_v34 }
 0x209   : > { %v163_v37 = vsel %vm162_vm6, %v160_v36, 0.0 }
 0x20a   : > { %v164_v38 = vadd.f32 %v163_v37, %v142_v26 }
 0x20c   : > { %165 = vst [vmem:[#allocation2] sm:$0xff] %v164_v38 }
 0x213   : > { %v169_v39 = vld [vmem:[#allocation2] sm:$0xf] }
 0x214   : > { %171 = vst [vmem:[%s98_s21] sm:$0xf] %v169_v39 }
 0x21b   : > { %v195_v40 = vld [vmem:[%s98_s21] sm:$0xf] }
 0x21c   : > { %196 = vst [vmem:[%s179_s25] sm:$0xf] %v195_v40 }
 0x21d PF: > { %s7_s8 = sadd.s32 1, %s330_s8   ;;  %s392_s6 = smov %s326_s7 }
 0x21e   : > { %p4_p5 = scmp.ge.s32.totalorder %s7_s8, 4   ;;  %s393_s7 = smov %s395_s10 }
 0x220   :  { %6 = sbr.rel (!%p4_p5) target bundleno = 2 (0x2), region = 114 }

// kernel: custom-call.56
= control target key start
LH: loop header
LB: loop body
LE: loop exit
PB: predicated region body
PF: predicated region fallthrough
CT: control target
= control target key end

     0   :  { %s343_s6 = smov 0   ;;  %s345_s7 = smov 0   ;;  %s390_s0 = inlined_call_operand.vmem [shape: f32[2,1,3,3], index: 0, kind: input, shape index: {}]   ;;  %s391_s1 = inlined_call_operand.vmem [shape: f32[2,1,3,3], index: 1, kind: output, shape index: {}]  }
   0x1   :  { %s347_s8 = smov 0  }
   0x2 LB: > { %s269_s9 = sadd.s32 4294967295, %s330_s8   ;;  %s33_s10 = sadd.s32 1, %s326_s7  ;;  %s330_s8 = sphi %s347_s8, %s7_s8   ;;  %s326_s7 = sphi %s345_s7, %s393_s7   ;;  %s322_s6 = sphi %s343_s6, %s392_s6  }
   0x3   : > { %p35_p0 = scmp.ge.s32.totalorder %s33_s10, 2  ;;  %p271_p1 = scmp.ge.s32.totalorder %s330_s8, 2 }
   0x4   : > { %s49_s11 = sand.u32 (!%p271_p1), 1, %s330_s8   ;;  %s273_s12 = sshll.u32 (!%p271_p1), %s326_s7, 2 }
   0x5   : > { %s395_s10 = smov (%p35_p0, %s33_s10), 0  ;;  %47 = sbr.rel (%p271_p1) target bundleno = 12 (0xc), region = 16 }
   0x6   : > { %s272_s13 = sshll.u32 (!%p271_p1), %s49_s11, 2  ;;  %s56_s16 = scalar_lea.vmem (!%p271_p1), %s390_s0, %s273_s12 }
   0x7   : > { %v72_v0 = vld [vmem:[%s56_s16] sm:$0xf] (!%p271_p1)  ;;  %s51_s17 = scalar_lea.vmem (!%p271_p1), [#allocation1], %s272_s13 }
   0x8   : > { %73 = vst [vmem:[%s51_s17] sm:$0xf] (!%p271_p1), %v72_v0 }
   0xc PF: > { %p274_p2 = scmp.ge.s32.totalorder %s330_s8, 1  ;;  %p89_p3 = scmp.lt.s32.totalorder %s330_s8, 3 }
   0xe   : > { %p90_p4 = pnand %p274_p2, %p89_p3 }
  0x10   : > { %93 = sbr.rel (%p90_p4) target bundleno = 511 (0x1ff), region = 50 }
  0x17   : > { %s370_s18 = sand.u32 1, %s269_s9   ;;  %v111_v1 = vlaneseq  ;;  %v332_v11 = vmov -1.0   ;;  %s278_s22 = sshll.u32 %s322_s6, 2 }
  0x18   : > { %s275_s19 = sshll.u32 %s370_s18, 2  ;;  %s178_s25 = scalar_lea.vmem %s391_s1, %s278_s22 }
  0x19   : > { %s102_s20 = scalar_lea.vmem [#allocation1], %s275_s19  ;;  %v112_v3 = vand.u32 127, %v111_v1  ;;  %v115_v4 = vshrl.u32 %v111_v1, 7  ;;  %s106_s21 = scalar_lea.vmem [#allocation3], %s275_s19 }
  0x1a   : > { %v109_v2 = vld [vmem:[%s102_s20] sm:$0xf] }
  0x1b   : > { %110 = vst [vmem:[#allocation0] sm:$0xf] %v109_v2  ;;  %vm113_vm0 = vcmp.lt.s32.totalorder %v112_v3, 3  ;;  %vm122_vm1 = vcmp.ge.s32.totalorder %v115_v4, %v112_v3  ;;  %vm117_vm2 = vcmp.eq.s32.totalorder %v115_v4, %v112_v3  ;;  %vm136_vm4 = vcmp.eq.s32.totalorder %v112_v3, 0 }
  0x1c   : > { %vm123_vm3 = vmand %vm122_vm1, %vm113_vm0  ;;  %vm133_vm5 = vcmp.eq.s32.totalorder %v112_v3, %v115_v4  ;;  %v137_v12 = vsel %vm136_vm4, 1.0, %v332_v11  ;;  %vm144_vm6 = vcmp.eq.s32.totalorder %v112_v3, 1  ;;  %vm154_vm7 = vcmp.eq.s32.totalorder %v112_v3, 2 }
  0x1d   : > { %v138_v13 = vsel %vm133_vm5, %v137_v12, 0.0 }
  0x22   : > { %v118_v5 = vld [vmem:[#allocation0] sm:$0xff] }
  0x23   : > { %v119_v6 = vsel %vm117_vm2, %v118_v5, 0.0  ;;  %v124_v7 = vsel %vm123_vm3, %v118_v5, 0.0 }
  0x24   : > { %120 = vadd.xlane.f32.xlu0 %v119_v6 }
  0xb1   : > { %v121_v8 = vpop.xlane.xlu0 %120 }
  0xb2   : > { %306 = vrcp.f32 %v121_v8  ;;  %vm161_vm8 = vweird.f32 %v121_v8 }
  0xbc   : > { %v307_v9 = vpop.eup %306 }
  0xbd   : > { %v126_v10 = vmul.f32 %v307_v9, %v124_v7 }
  0xbf   : > { %127 = vst [vmem:[#allocation4] sm:$0xff] %v126_v10 }
  0xc6   : > { %v140_v14 = vld [vmem:[#allocation4 + $0x1] ss:$0 sm:$0xff]  ;;  %v150_v17 = vld [vmem:[#allocation4 + $0x2] ss:$0 sm:$0xff] }
  0xc7   : > { %v141_v15 = vxor.u32 2147483648, %v140_v14  ;;  %v151_v19 = vxor.u32 2147483648, %v150_v17 }
  0xc9   : > { %v145_v16 = vmul.f32 %v141_v15, %v138_v13 }
  0xcb   : > { %146 = vadd.xlane.f32.xlu0 %v145_v16 }
 0x158   : > { %v147_v18 = vpop.xlane.xlu0 %146 }
 0x159   : > { %v148_v20 = vsel %vm144_vm6, %v147_v18, %v138_v13 }
 0x15a   : > { %v155_v21 = vmul.f32 %v151_v19, %v148_v20 }
 0x15c   : > { %156 = vadd.xlane.f32.xlu1 %v155_v21 }
 0x1e9   : > { %v157_v22 = vpop.xlane.xlu1 %156 }
 0x1ea   : > { %v158_v23 = vsel %vm154_vm7, %v157_v22, %v148_v20 }
 0x1eb   : > { %v160_v24 = vmul.f32 %v307_v9, %v158_v23 }
 0x1ed   : > { %v162_v25 = vsel %vm161_vm8, %v158_v23, %v160_v24 }
 0x1ee   : > { %163 = vst [vmem:[#allocation2] sm:$0xff] %v162_v25 }
 0x1f5   : > { %v167_v26 = vld [vmem:[#allocation2] sm:$0xf] }
 0x1f6   : > { %169 = vst [vmem:[%s106_s21] sm:$0xf] %v167_v26 }
 0x1fd   : > { %v194_v27 = vld [vmem:[%s106_s21] sm:$0xf] }
 0x1fe   : > { %195 = vst [vmem:[%s178_s25] sm:$0xf] %v194_v27 }
 0x1ff PF: > { %s7_s8 = sadd.s32 1, %s330_s8   ;;  %s392_s6 = smov %s326_s7 }
 0x200   : > { %p4_p5 = scmp.ge.s32.totalorder %s7_s8, 4   ;;  %s393_s7 = smov %s395_s10 }
 0x202   :  { %6 = sbr.rel (!%p4_p5) target bundleno = 2 (0x2), region = 112 }

// kernel: loss_forward.1
= control target key start
LH: loop header
LB: loop body
LE: loop exit
PB: predicated region body
PF: predicated region fallthrough
CT: control target
= control target key end

     0   :  { %s1550_s0 = inlined_call_operand.hbm [shape: f32[2,9,9], index: 0, kind: input, shape index: {}]   ;;  %s1551_s1 = inlined_call_operand.hbm [shape: f32[2,8,4], index: 1, kind: input, shape index: {}]   ;;  %s1552_s2 = inlined_call_operand.hbm [shape: f32[2,8,3], index: 2, kind: input, shape index: {}]   ;;  %s1553_s3 = inlined_call_operand.hbm [shape: s32[2,1,8], index: 3, kind: input, shape index: {}]   ;;  %s1554_s4 = inlined_call_operand.hbm [shape: f32[2,1,128], index: 4, kind: output, shape index: {}]  }
   0x1   :  { %1561 = sst [smem:[#allocation17_spill]] %s1551_s1 }
   0x2   :  { %9 = vsyncpa [#allocation3], 0 }
   0x3   :  { %11 = vsyncpa [#allocation3 + $0x1], 0 }
   0x4   :  { %12 = vsyncpa [#allocation6], 0 }
   0x5   :  { %14 = vsyncpa [#allocation6 + $0x1], 0 }
   0x6   :  { %15 = vsyncpa [#allocation9], 0 }
   0x7   :  { %17 = vsyncpa [#allocation9 + $0x1], 0 }
   0x8   :  { %18 = vsyncpa [#allocation4], 0 }
   0x9   :  { %20 = vsyncpa [#allocation4 + $0x1], 0  ;;  %s1218_s15 = smov 0   ;;  %s1220_s16 = smov 0  }
   0xa   :  { %s1222_s17 = smov 0   ;;  %s1224_s18 = smov 0  }
   0xb LB: > { %1562 = sst [smem:[#allocation15_spill]] %s1170_s17  ;;  %s1239_s19 = sadd.s32 4294967295, %s1174_s18   ;;  %s1174_s18 = sphi %s1224_s18, %s1585_s18   ;;  %s1170_s17 = sphi %s1222_s17, %s1582_s17   ;;  %s1166_s16 = sphi %s1220_s16, %s1584_s16   ;;  %s1162_s15 = sphi %s1218_s15, %s1583_s15  }
   0xc   : > { %s849_s20 = sadd.s32 4294967294, %s1174_s18   ;;  %s1243_s21 = sadd.s32 1, %s1174_s18  }
   0xd   : > { %s33_s22 = sadd.s32 1, %s1170_s17  ;;  %s30_s23 = ssub.s32 %s1174_s18, %s1243_s21 }
   0xe   : > { %p40_p0 = scmp.ne.s32.totalorder %s1170_s17, %s1166_s16  ;;  %p31_p1 = scmp.eq.s32.totalorder %s30_s23, 0 }
   0xf   : > { %p41_p2 = scmp.eq.s32.totalorder %s1174_s18, 0  ;;  %p46_p3 = scmp.ne.s32.totalorder %s1166_s16, %s1162_s15 }
  0x10   : > { %p47_p4 = scmp.eq.s32.totalorder %s1239_s19, 0  ;;  %p148_p7 = scmp.eq.s32.totalorder %s1239_s19, 1 }
  0x11   : > { %s1255_s24 = scalar_select %p31_p1, %s1170_s17, %s33_s22  }
  0x12   : > { %p42_p5 = por %p41_p2, %p40_p0  ;;  %p1257_p6 = por %p47_p4, %p46_p3 }
  0x13   : > { %1563 = sst [smem:[#allocation16_spill]] %s1255_s24  ;;  %p154_p8 = scmp.eq.s32.totalorder %s849_s20, 1 }
  0x14   : > { %s1564_s25 = scalar_select %p1257_p6, 1, 0 }
  0x15   : > { %p922_p10 = scmp.lt.s32.totalorder %s1174_s18, 2  ;;  %p1264_p11 = por %p148_p7, %p40_p0 }
  0x16   : > { %p1268_p12 = por %p154_p8, %p46_p3  ;;  %s1273_s28 = sand.u32 1, %s1170_s17  }
  0x17   : > { %s1565_s26 = scalar_select %p1264_p11, 1, 0 }
  0x18   : > { %s1566_s27 = scalar_select %p1268_p12, 1, 0 }
  0x19   : > { %p1275_p13 = pnand %p922_p10, %p42_p5  ;;  %s195_s30 = sand.u32 1, %s1174_s18  }
  0x1a   : > { %s1557_s5 = sshll.u32 %s1273_s28, 3  ;;  %s856_s6 = sshll.u32 %s1174_s18, 7 }
  0x1b   : > { %s1567_s29 = scalar_select %p1275_p13, 1, 0 }
  0x1c   : > { %s1568_s1 = sld [smem:[#allocation17_spill]]  ;;  %s199_s10 = scalar_lea.vmem [#allocation5], %s1557_s5 }
  0x1d   : > { %s206_s11 = sshll.u32 %s199_s10, 4  ;;  %s1293_s12 = scalar_lea.sflag [#allocation6], %s195_s30  ;;  %s1291_s11 = int_to_ptr.vmem [resolvable:$true] %s206_s11 }
  0x1e   : > { %p1299_p1 = pneg %p1275_p13 }
  0x22   : > { %s1287_s9 = scalar_lea.hbm %s1568_s1, %s856_s6  ;;  %s985_s23 = scalar_lea.hbm %s1568_s1, 256 }
  0x23   : > { %s980_s13 = scalar_lea.hbm %s1287_s9, 128  ;;  %p986_p4 = scmp.lt.u32.totalorder %s1287_s9, %s1568_s1 }
  0x24   : > { %p981_p0 = scmp.ne.s32.totalorder %s1287_s9, %s980_s13  ;;  %p987_p5 = scmp.lt.u32.totalorder %s985_s23, %s980_s13 }
  0x25   : > { %p989_p8 = scmp.lt.u32.totalorder %s980_s13, %s1287_s9 }
  0x26   : > { %p983_p2 = pnand %p1299_p1, %p981_p0  ;;  %p988_p7 = por %p987_p5, %p986_p4 }
  0x28   : > { %p984_p3 = pneg %p983_p2  ;;  %p990_p10 = por %p989_p8, %p988_p7 }
  0x2a   : > { %p991_p9 = pnand %p990_p10, %p984_p3 }
  0x2c   : > { %994 = shalt.err (!%p991_p9)
}
  0x2d   : > { %s995_s30 = scalar_lea.vmem %s1291_s11, 128  ;;  %s1176_s10 = smov [#allocation5]  }
  0x2e   : > { %p996_p0 = scmp.ne.s32.totalorder %s1291_s11, %s995_s30  ;;  %s1000_s20 = sshll.u32 %s1176_s10, 4  ;;  %s1001_s20 = int_to_ptr.vmem [resolvable:$false] %s1000_s20 }
  0x2f   : > { %s1002_s22 = scalar_lea.vmem %s1001_s20, 256  ;;  %p1003_p11 = scmp.lt.s32.totalorder %s1291_s11, %s1001_s20 }
  0x30   : > { %p998_p2 = pnand %p996_p0, %p1299_p1  ;;  %p1004_p6 = scmp.lt.s32.totalorder %s1002_s22, %s995_s30 }
  0x32   : > { %p999_p12 = pneg %p998_p2  ;;  %p1005_p4 = por %p1004_p6, %p1003_p11 }
  0x34   : > { %p1006_p5 = pnand %p1005_p4, %p999_p12 }
  0x36   : > { %1009 = shalt.err (!%p1006_p5)
}
  0x37   : > { %911 = dma.hbm_to_vmem [thread:$0]  (!%p1275_p13), %s1287_s9, 128, %s1291_s11, %s1293_s12  }
  0x38   : > { %s1328_s7 = scalar_lea.hbm %s1552_s2, %s856_s6  ;;  %p860_p6 = scmp.ge.s32.totalorder %s1174_s18, 1 }
  0x39   : > { %p246_p9 = scmp.lt.s32.totalorder %s1174_s18, 3  ;;  %s852_s8 = sshll.u32 %s1273_s28, 4 }
  0x3a   : > { %s870_s30 = sshll.u32 %s1174_s18, 8  ;;  %s178_s9 = scalar_lea.vmem [#allocation2], %s852_s8 }
  0x3b   : > { %p1334_p11 = pnand %p860_p6, %p246_p9  ;;  %s1341_s5 = scalar_lea.hbm %s1550_s0, %s870_s30 }
  0x3c   : > { %s185_s6 = sshll.u32 %s178_s9, 4  ;;  %s1571_s11 = sshll.u32 %s1273_s28, 3  ;;  %s1343_s6 = int_to_ptr.vmem [resolvable:$true] %s185_s6 }
  0x3d   : > { %s1570_s10 = scalar_select %p1334_p11, 1, 0 }
  0x3e   : > { %s1347_s13 = scalar_lea.vmem [#allocation7], %s1571_s11  ;;  %s175_s1 = scalar_lea.sflag [#allocation3], %s1273_s28 }
  0x3f   : > { %s224_s23 = sshll.u32 %s1347_s13, 4  ;;  %s1010_s24 = scalar_lea.hbm %s1341_s5, 256  ;;  %s225_s23 = int_to_ptr.vmem [resolvable:$true] %s224_s23 }
  0x40   : > { %p1011_p12 = scmp.ne.s32.totalorder %s1341_s5, %s1010_s24  ;;  %s1015_s22 = scalar_lea.hbm %s1550_s0, 512 }
  0x41   : > { %p1016_p8 = scmp.lt.u32.totalorder %s1341_s5, %s1550_s0  ;;  %p1017_p10 = scmp.lt.u32.totalorder %s1015_s22, %s1010_s24 }
  0x42   : > { %p1013_p3 = pnand %p1011_p12, %p1299_p1  ;;  %p1019_p2 = scmp.lt.u32.totalorder %s1010_s24, %s1341_s5 }
  0x43   : > { %p1018_p0 = por %p1017_p10, %p1016_p8 }
  0x44   : > { %p1014_p7 = pneg %p1013_p3 }
  0x45   : > { %p1020_p4 = por %p1019_p2, %p1018_p0 }
  0x47   : > { %p1021_p5 = pnand %p1020_p4, %p1014_p7 }
  0x49   : > { %1024 = shalt.err (!%p1021_p5)
}
  0x4a   : > { %s1025_s9 = scalar_lea.vmem %s1343_s6, 256  ;;  %s1177_s11 = smov [#allocation2]  }
  0x4b   : > { %p1026_p6 = scmp.ne.s32.totalorder %s1343_s6, %s1025_s9  ;;  %s1030_s30 = sshll.u32 %s1177_s11, 4  ;;  %s1031_s30 = int_to_ptr.vmem [resolvable:$false] %s1030_s30 }
  0x4c   : > { %s1032_s17 = scalar_lea.vmem %s1031_s30, 512  ;;  %p1033_p3 = scmp.lt.s32.totalorder %s1343_s6, %s1031_s30 }
  0x4d   : > { %p1028_p9 = pnand %p1026_p6, %p1299_p1  ;;  %p1034_p11 = scmp.lt.s32.totalorder %s1032_s17, %s1025_s9 }
  0x4f   : > { %p1029_p12 = pneg %p1028_p9  ;;  %p1035_p8 = por %p1034_p11, %p1033_p3 }
  0x51   : > { %p1036_p10 = pnand %p1035_p8, %p1029_p12 }
  0x53   : > { %1039 = shalt.err (!%p1036_p10)
}
  0x54   : > { %s1178_s24 = smov 128   ;;  %s1179_s20 = smov 8  }
  0x55   : > { %908 = dma.hbm_to_vmem [thread:$0]  (!%p1275_p13), %s1341_s5, 256, %s1343_s6, %s175_s1, %s1178_s24, %s1178_s24, %s1179_s20  }
  0x56   : > { %s1040_s22 = scalar_lea.hbm %s1328_s7, 128  ;;  %s1045_s11 = scalar_lea.hbm %s1552_s2, 256 }
  0x57   : > { %p1041_p11 = scmp.ne.s32.totalorder %s1328_s7, %s1040_s22  ;;  %p1046_p2 = scmp.lt.u32.totalorder %s1328_s7, %s1552_s2 }
  0x58   : > { %p1047_p4 = scmp.lt.u32.totalorder %s1045_s11, %s1040_s22  ;;  %p1049_p6 = scmp.lt.u32.totalorder %s1040_s22, %s1328_s7 }
  0x59   : > { %p1043_p7 = pnand %p1041_p11, %p1299_p1 }
  0x5a   : > { %p1048_p5 = por %p1047_p4, %p1046_p2 }
  0x5b   : > { %p1044_p0 = pneg %p1043_p7 }
  0x5c   : > { %p1050_p9 = por %p1049_p6, %p1048_p5 }
  0x5e   : > { %p1051_p12 = pnand %p1050_p9, %p1044_p0 }
  0x60   : > { %1054 = shalt.err (!%p1051_p12)
}
  0x61   : > { %s1055_s1 = scalar_lea.vmem %s225_s23, 128  ;;  %s1180_s5 = smov [#allocation7]  }
  0x62   : > { %p1056_p3 = scmp.ne.s32.totalorder %s225_s23, %s1055_s1  ;;  %s1060_s6 = sshll.u32 %s1180_s5, 4  ;;  %s1061_s6 = int_to_ptr.vmem [resolvable:$false] %s1060_s6 }
  0x63   : > { %s1062_s13 = scalar_lea.vmem %s1061_s6, 256  ;;  %p1063_p11 = scmp.lt.s32.totalorder %s225_s23, %s1061_s6 }
  0x64   : > { %p1058_p8 = pnand %p1056_p3, %p1299_p1  ;;  %p1064_p7 = scmp.lt.s32.totalorder %s1062_s13, %s1055_s1 }
  0x66   : > { %p1059_p10 = pneg %p1058_p8  ;;  %p1065_p13 = por %p1064_p7, %p1063_p11 }
  0x68   : > { %p1066_p2 = pnand %p1065_p13, %p1059_p10 }
  0x6a   : > { %1069 = shalt.err (!%p1066_p2)
}
  0x6b   : > { %p1572_p4 = scmp.ne.s32.totalorder %s1567_s29, 0  ;;  %s859_s24 = sshll.u32 %s1174_s18, 4 }
  0x6c   : > { %s1398_s8 = scalar_lea.hbm %s1553_s3, %s859_s24  ;;  %s234_s9 = scalar_lea.vmem [#allocation8], %s1273_s28 }
  0x6d   : > { %914 = dma.hbm_to_vmem [thread:$0]  (!%p1572_p4), %s1328_s7, 128, %s225_s23, %s1293_s12  }
  0x6e   : > { %s241_s11 = sshll.u32 %s234_s9, 4  ;;  %s232_s30 = scalar_lea.sflag [#allocation9], %s1273_s28  ;;  %s242_s11 = int_to_ptr.vmem [resolvable:$true] %s241_s11 }
  0x6f   : > { %s1070_s17 = scalar_lea.hbm %s1398_s8, 16  ;;  %s1075_s23 = scalar_lea.hbm %s1553_s3, 32 }
  0x70   : > { %p1071_p13 = scmp.ne.s32.totalorder %s1398_s8, %s1070_s17  ;;  %p1076_p6 = scmp.lt.u32.totalorder %s1398_s8, %s1553_s3 }
  0x71   : > { %p1077_p9 = scmp.lt.u32.totalorder %s1075_s23, %s1070_s17  ;;  %p1079_p3 = scmp.lt.u32.totalorder %s1070_s17, %s1398_s8 }
  0x72   : > { %p1073_p0 = pnand %p1071_p13, %p1299_p1 }
  0x73   : > { %p1078_p12 = por %p1077_p9, %p1076_p6 }
  0x74   : > { %p1074_p5 = pneg %p1073_p0 }
  0x75   : > { %p1080_p8 = por %p1079_p3, %p1078_p12 }
  0x77   : > { %p1081_p10 = pnand %p1080_p8, %p1074_p5 }
  0x79   : > { %1084 = shalt.err (!%p1081_p10)
}
  0x7a   : > { %s1085_s28 = scalar_lea.vmem %s242_s11, 16  ;;  %s1181_s6 = smov [#allocation8]  }
  0x7b   : > { %p1086_p11 = scmp.ne.s32.totalorder %s242_s11, %s1085_s28  ;;  %s1090_s13 = sshll.u32 %s1181_s6, 4  ;;  %s1091_s13 = int_to_ptr.vmem [resolvable:$false] %s1090_s13 }
  0x7c   : > { %s1092_s24 = scalar_lea.vmem %s1091_s13, 32  ;;  %p1093_p13 = scmp.lt.s32.totalorder %s242_s11, %s1091_s13 }
  0x7d   : > { %p1088_p7 = pnand %p1086_p11, %p1299_p1  ;;  %p1094_p0 = scmp.lt.s32.totalorder %s1092_s24, %s1085_s28 }
  0x7f   : > { %p1089_p2 = pneg %p1088_p7  ;;  %p1095_p4 = por %p1094_p0, %p1093_p13 }
  0x81   : > { %p1096_p6 = pnand %p1095_p4, %p1089_p2 }
  0x83   : > { %1099 = shalt.err (!%p1096_p6)
}
  0x84   : > { %p1573_p9 = scmp.ne.s32.totalorder %s1567_s29, 0  ;;  %p1574_p5 = scmp.ne.s32.totalorder %s1570_s10, 0 }
  0x85   : > { %s1422_s14 = sand.u32 (!%p1574_p5), 1, %s1166_s16   ;;  %p1575_p1 = scmp.ne.s32.totalorder (!%p1574_p5), %s1564_s25, 0 }
  0x86   : > { %917 = dma.hbm_to_vmem [thread:$0]  (!%p1573_p9), %s1398_s8, 16, %s242_s11, %s232_s30  }
  0x87   : > { %250 = sbr.rel (%p1574_p5) target bundleno = 1468 (0x5bc), region = 36  ;;  %s861_s20 = sshll.u32 (!%p1574_p5), %s1422_s14, 4 }
  0x88   : > { %s253_s22 = scalar_lea.sflag (!%p1574_p5), [#allocation3], %s1422_s14  ;;  %s1426_s9 = scalar_lea.vmem (!%p1574_p5), [#allocation2], %s861_s20 }
  0x8e   : > { %1145 = dma.done.wait (%p1575_p1), %s253_s22, 256  }
  0x8f   : > { %1147 = vsyncadd (%p1575_p1), %s253_s22, 4294967040  ;;  %s261_s29 = sand.u32 1, %s1239_s19   ;;  %s862_s10 = sshll.u32 %s1422_s14, 3 }
  0x90   : > { %s262_s8 = scalar_lea.sflag [#allocation6], %s261_s29  ;;  %s265_s11 = scalar_lea.vmem [#allocation5], %s862_s10 }
  0x91   : > { %1149 = dma.done.wait (%p1575_p1), %s262_s8, 256  }
  0x92   : > { %1151 = vsyncadd (%p1575_p1), %s262_s8, 4294967040  ;;  %s1438_s30 = scalar_lea.vmem [#allocation7], %s862_s10  ;;  %s280_s17 = scalar_lea.sflag [#allocation9], %s1422_s14 }
  0x93   : > { %s282_s12 = scalar_lea.vmem [#allocation8], %s1422_s14 }
  0x94   : > { %1153 = dma.done.wait (%p1575_p1), %s280_s17, 16  }
  0x95   : > { %1155 = vsyncadd (%p1575_p1), %s280_s17, 4294967280  ;;  %v1182_v0 = vmov 0.0   ;;  %vm1183_vm0 = vmmov 0   ;;  %v1451_v1 = vld [vmem:[%s1426_s9] sm:$0xff]  ;;  %vm359_vm1 = vcmask 64512   ;;  %v1184_v6 = vmov 3  }
  0x96   : > { %875 = vmatprep.subr.mxu0 %v1182_v0  ;;  %877 = vmatprep.mubr.msk.f32.mxu0 %vm1183_vm0, %v1182_v0  ;;  %v322_v2 = vld [vmem:[%s265_s11] sm:$0xff]  ;;  %v325_v3 = vmul.f32 1.442695, %v1451_v1  ;;  %s1185_s25 = smov 125   ;;  %vm445_vm2 = vcmask 7168   ;;  %v605_v13 = vlaneseq  ;;  %v1186_v15 = vmov 0  }
  0x97   : > { %880 = vmatprep.subr.mxu1 %v1182_v0  ;;  %882 = vmatprep.mubr.msk.f32.mxu1 %vm1183_vm0, %v1182_v0  ;;  %v1458_v12 = vld [vmem:[%s282_s12] sm:$0x1]  ;;  %s1473_s23 = scalar_lea.vmem [#allocation10], %s1422_s14  ;;  %v323_v36 = vld [vmem:[%s1438_s30] sm:$0xff]  ;;  %vm466_vm7 = vcmask 23552   ;;  %vm677_vm8 = vcmask 16384  }
  0x98   : > { %876 = vmatpush3.msra.mxu0 %v322_v2  ;;  %970 = vpow2.f32 %v325_v3  ;;  %968 = vset.pattern.permute.xlu1 %v1184_v6  ;;  %vm590_vm3 = vcmp.gt.s32.totalorder %v1458_v12, 4294967295  ;;  %v606_v14 = vshrl.u32 %v605_v13, 7  ;;  %676 = vst [vmem:[%s1473_s23] sm:$0x1] %v1182_v0  ;;  %vm593_vm9 = vcmask 57344   ;;  %s1187_s1 = smov 120   ;;  %s1188_s5 = smov 3  }
  0x99   : > { %v591_v16 = vsel %vm590_vm3, 1, %v1186_v15  ;;  %v866_v58 = vsel %vm590_vm3, 1.0, %v1182_v0  ;;  %vm640_vm10 = vcmp.eq.s32.totalorder %v1458_v12, 4294967295  ;;  %vm683_vm11 = vcmask 40984   ;;  %s1189_s28 = smov 6   ;;  %s1190_s6 = smov 9  }
  0x9a   : > { %v609_v17 = vsub.s32 0, %v606_v14  ;;  %v594_v60 = vsel %vm593_vm9, %v866_v58, 0.0  ;;  %s1191_s13 = smov 12   ;;  %vm689_vm12 = vcmask 65584   ;;  %vm694_vm14 = vcmask 91209   ;;  %s867_s29 = sshll.u32 %s1239_s19, 4 }
  0x9b   : > { %vm699_vm15 = vcmask 116834   ;;  %vm701_vm0 = vcmask 123000   ;;  %s720_s10 = sshll.u32 %s1473_s23, 4  ;;  %s1504_s30 = scalar_lea.hbm %s1554_s4, %s867_s29  ;;  %s1506_s10 = int_to_ptr.vmem [resolvable:$true] %s720_s10 }
  0x9c   : > { %v610_v18 = vrot.slane %v1458_v12, %v609_v17  ;;  %v615_v19 = vrot.slane %v591_v16, %v609_v17  ;;  %s708_s19 = scalar_lea.sflag [#allocation4], %s1422_s14  ;;  %s1100_s17 = scalar_lea.vmem %s1506_s10, 16 }
  0x9d   : > { %p1101_p4 = scmp.ne.s32.totalorder %s1506_s10, %s1100_s17  ;;  %p1578_p12 = scmp.ne.s32.totalorder %s1565_s26, 0 }
  0x9e   : > { %vm611_vm4 = vcmp.eq.s32.totalorder %v606_v14, %v610_v18  ;;  %vm616_vm5 = vcmp.eq.s32.totalorder %v615_v19, 1  ;;  %s1192_s12 = smov [#allocation10]  }
  0x9f   : > { %vm1464_vm6 = vmand %vm611_vm4, %vm616_vm5  ;;  %p1102_p3 = pnand %p1101_p4, %p1578_p12 }
  0xa0   : > { %v635_v21 = vsel %vm1464_vm6, 1.0, %v1182_v0  ;;  %v622_v59 = vsel %vm1464_vm6, %v1451_v1, 0.0 }
  0xa1   : > { %v636_v22 = vsel %vm359_vm1, %v635_v21, -inf  ;;  %v623_v61 = vsel %vm359_vm1, %v622_v59, 0.0  ;;  %p1103_p8 = pneg %p1102_p3 }
  0xa2   : > { %v971_v4 = vpop.eup %970 }
  0xa3   : > { %327 = vxpose.xlu0.b32.start.end [1/1] (short) (narrow) %v971_v4, 8  ;;  %v321_v4 = vld [vmem:[%s1426_s9 + $0x8] sm:$0x1] }
  0xcc   : > { %969 = vset.pattern.permute.xlu0 %v1184_v6 }
 0x123   : > { %v343_v5 = vpop.trf.xlu0 }
 0x124   : > { %878 = vmatmul.mubr.msk.f32.vlgmr.msra.gmra.mrb[0].mxu0 %vm359_vm1, %v343_v5  ;;  %v641_v5 = vsel %vm640_vm10, 1.0, %v1182_v0 }
 0x125   : > { %v663_v6 = vmul.f32 %v641_v5, %v321_v4 }
 0x1f7   : > { %v429_v7 = vpop.f32.mrb[0].mxu0 }
 0x1f8   : > { %442 = vrot.lane.b32.xlu0 %v429_v7, %s1185_s25  ;;  %v879_v8 = vpop.f32.mrb[1].mxu0  ;;  %v433_v11 = vadd.f32 1.1920929e-07, %v429_v7  ;;  %s1104_s25 = sshll.u32 %s1192_s12, 4  ;;  %s1105_s25 = int_to_ptr.vmem [resolvable:$false] %s1104_s25 }
 0x1f9   : > { %p1107_p10 = scmp.lt.s32.totalorder %s1506_s10, %s1105_s25 }
 0x217   : > { %637 = vmax.xlane.f32.xlu0 %v636_v22 }
 0x21b   : > { %595 = vadd.xlane.f32.xlu0 %v594_v60 }
 0x21f   : > { %624 = vadd.xlane.f32.xlu0 %v623_v61 }
 0x26a   : > { %v443_v9 = vpop.permute.xlu0 %442 }
 0x26b   : > { %v446_v10 = vsel %vm445_vm2, %v443_v9, 0.0  ;;  %v664_v9 = vsel %vm593_vm9, %v663_v6, 0.0 }
 0x26c   : > { %447 = vadd.xlane.f32.xlu1 %v446_v10 }
 0x27d   : > { %436 = vperm.xlu1 %968, %v433_v11  }
 0x2a4   : > { %v638_v62 = vpop.xlane.xlu0 %637 }
 0x2a5   : > { %v639_v63 = vsub.f32 1.0, %v638_v62 }
 0x2a7   : > { %v646_v2 = vmul.f32 %v639_v63, %v1451_v1 }
 0x2a8   : > { %v596_v1 = vpop.xlane.xlu0 %595 }
 0x2a9   : > { %v597_v11 = vrot.slane %v596_v1, 4 }
 0x2ab   : > { %v598_v14 = vadd.f32 %v597_v11, %v596_v1 }
 0x2ac   : > { %v625_v10 = vpop.xlane.xlu0 %624 }
 0x2ad   : > { %v626_v13 = vrot.slane %v625_v10, 4  ;;  %v599_v12 = vrot.slane %v598_v14, 2 }
 0x2af   : > { %v627_v15 = vadd.f32 %v626_v13, %v625_v10  ;;  %v600_v17 = vadd.f32 %v599_v12, %v598_v14 }
 0x2b1   : > { %v628_v16 = vrot.slane %v627_v15, 2  ;;  %v601_v18 = vrot.slane %v600_v17, 1 }
 0x2b3   : > { %v629_v0 = vadd.f32 %v628_v16, %v627_v15  ;;  %v602_v20 = vadd.f32 %v601_v18, %v600_v17 }
 0x2b5   : > { %v630_v19 = vrot.slane %v629_v0, 1 }
 0x2b7   : > { %v631_v21 = vadd.f32 %v630_v19, %v629_v0 }
 0x2f9   : > { %v448_v23 = vpop.xlane.xlu1 %447 }
 0x2fa   : > { %v449_v24 = vrot.slane %v448_v23, 4 }
 0x2fc   : > { %v450_v25 = vadd.f32 %v449_v24, %v448_v23 }
 0x2fd   : > { %v437_v34 = vpop.permute.xlu1 %436 }
 0x2fe   : > { %v451_v26 = vrot.slane %v450_v25, 2 }
 0x300   : > { %v452_v27 = vadd.f32 %v451_v26, %v450_v25 }
 0x302   : > { %v453_v28 = vrot.slane %v452_v27, 1 }
 0x304   : > { %v454_v29 = vadd.f32 %v453_v28, %v452_v27 }
 0x306   : > { %885 = vpush %v454_v29 }
 0x307   : > { %887 = vpush %v602_v20 }
 0x308   : > { %889 = vpush %v631_v21 }
 0x337   : > { %s886_s7 = spop %885 }
 0x338   : > { %v456_v30 = vstv %s886_s7  ;;  %s888_s24 = spop %887  ;;  %s1106_s7 = scalar_lea.vmem %s1105_s25, 32 }
 0x339   : > { %v457_v31 = vadd.f32 1.1920929e-07, %v456_v30  ;;  %s890_s20 = spop %889  ;;  %p1108_p11 = scmp.lt.s32.totalorder %s1106_s7, %s1100_s17 }
 0x33b   : > { %972 = vrcp.f32 %v457_v31  ;;  %p1109_p7 = por %p1108_p11, %p1107_p10 }
 0x33c   : > { %974 = vrcp.f32 %v437_v34 }
 0x33d   : > { %p1110_p2 = pnand %p1109_p7, %p1103_p8 }
 0x345   : > { %v973_v32 = vpop.eup %972 }
 0x346   : > { %v459_v33 = vmul.f32 %v973_v32, %v429_v7  ;;  %v975_v35 = vpop.eup %974 }
 0x347   : > { %v440_v37 = vmul.f32 %v975_v35, %v429_v7 }
 0x348   : > { %462 = vperm.xlu1 %968, %v459_v33  }
 0x3c7   : > { %v463_v38 = vpop.permute.xlu1 %462 }
 0x3c8   : > { %v465_v39 = vmul.f32 %v463_v38, %v440_v37  ;;  %v474_v40 = vmul.f32 %v463_v38, %v323_v36 }
 0x3ca   : > { %v467_v41 = vsel %vm466_vm7, %v465_v39, 0.0  ;;  %v475_v42 = vsel %vm466_vm7, %v474_v40, 0.0  ;;  %v604_v39 = vstv %s888_s24 }
 0x3cb   : > { %v468_v43 = vrot.slane %v467_v41, 4  ;;  %v476_v44 = vrot.slane %v475_v42, 4  ;;  %v642_v40 = vsub.f32 8.0, %v604_v39  ;;  %976 = vrcp.f32 %v604_v39 }
 0x3cc   : > { %vm618_vm13 = vcmp.gt.f32.partialorder %v604_v39, 0.0 }
 0x3cd   : > { %v469_v45 = vadd.f32 %v468_v43, %v467_v41  ;;  %v477_v46 = vadd.f32 %v476_v44, %v475_v42  ;;  %v643_v41 = vmax.f32 %v642_v40, 1.0 }
 0x3cf   : > { %v470_v47 = vrot.slane %v469_v45, 2  ;;  %v478_v48 = vrot.slane %v477_v46, 2  ;;  %978 = vrcp.f32 %v643_v41 }
 0x3d1   : > { %v471_v49 = vadd.f32 %v470_v47, %v469_v45  ;;  %v479_v50 = vadd.f32 %v478_v48, %v477_v46  ;;  %v633_v47 = vstv %s890_s20 }
 0x3d3   : > { %v472_v51 = vrot.slane %v471_v49, 1  ;;  %v480_v52 = vrot.slane %v479_v50, 1 }
 0x3d5   : > { %v473_v53 = vadd.f32 %v472_v51, %v471_v49  ;;  %v481_v54 = vadd.f32 %v480_v52, %v479_v50  ;;  %v977_v43 = vpop.eup %976 }
 0x3d6   : > { %v621_v46 = vsel %vm618_vm13, %v977_v43, 0.0 }
 0x3d7   : > { %v482_v55 = vsub.f32 %v440_v37, %v473_v53  ;;  %v483_v56 = vsub.f32 %v323_v36, %v481_v54  ;;  %678 = vst.msk [vmem:[%s1473_s23] sm:$0x1] %vm677_vm8, %v473_v53  ;;  %v634_v51 = vmul.f32 %v633_v47, %v621_v46 }
 0x3d9   : > { %v484_v57 = vmul.f32 %v482_v55, %v463_v38  ;;  %881 = vmatpush3.msra.mxu1 %v483_v56  ;;  %v979_v44 = vpop.eup %978 }
 0x3da   : > { %v645_v48 = vmul.f32 0.5, %v979_v44 }
 0x3db   : > { %485 = vxpose.xlu1.b32.start.end [1/1] (short) (narrow) %v484_v57, 8 }
 0x3f9   : > { %648 = vrot.lane.b32.xlu1 %v646_v2, %s1187_s1 }
 0x45b   : > { %v501_v3 = vpop.trf.xlu1 }
 0x45c   : > { %883 = vmatmul.mubr.msk.f32.vlgmr.msra.gmra.mrb[0].mxu1 %vm359_vm1, %v501_v3  ;;  %vm703_vm1 = vcmask 131200  }
 0x46b   : > { %v649_v7 = vpop.permute.xlu1 %648 }
 0x46c   : > { %v651_v8 = vsel %vm445_vm2, %v649_v7, 0.0  ;;  %vm705_vm2 = vcmask 139400  }
 0x46d   : > { %652 = vadd.xlane.f32.xlu0 %v651_v8 }
 0x471   : > { %665 = vadd.xlane.f32.xlu0 %v664_v9 }
 0x487   : > { %680 = vrot.lane.b32.xlu0 %v481_v54, %s1188_s5 }
 0x4fa   : > { %v653_v22 = vpop.xlane.xlu0 %652 }
 0x4fb   : > { %v654_v23 = vrot.slane %v653_v22, 4 }
 0x4fd   : > { %v655_v24 = vadd.f32 %v654_v23, %v653_v22 }
 0x4fe   : > { %v666_v25 = vpop.xlane.xlu0 %665 }
 0x4ff   : > { %v656_v26 = vrot.slane %v655_v24, 2  ;;  %v667_v27 = vrot.slane %v666_v25, 4 }
 0x501   : > { %v668_v28 = vadd.f32 %v667_v27, %v666_v25  ;;  %v657_v29 = vadd.f32 %v656_v26, %v655_v24 }
 0x502   : > { %v681_v30 = vpop.permute.xlu0 %680 }
 0x503   : > { %v669_v31 = vrot.slane %v668_v28, 2  ;;  %684 = vst.msk [vmem:[%s1473_s23] sm:$0x1] %vm683_vm11, %v681_v30  ;;  %v658_v32 = vrot.slane %v657_v29, 1 }
 0x505   : > { %v659_v33 = vadd.f32 %v658_v32, %v657_v29  ;;  %v670_v34 = vadd.f32 %v669_v31, %v668_v28 }
 0x507   : > { %891 = vpush %v659_v33  ;;  %v671_v35 = vrot.slane %v670_v34, 1 }
 0x509   : > { %v672_v36 = vadd.f32 %v671_v35, %v670_v34 }
 0x50b   : > { %893 = vpush %v672_v36 }
 0x52f   : > { %v586_v37 = vpop.f32.mrb[0].mxu1 }
 0x530   : > { %686 = vrot.lane.b32.xlu1 %v586_v37, %s1189_s28  ;;  %v884_v38 = vpop.f32.mrb[1].mxu1 }
 0x534   : > { %691 = vrot.lane.b32.xlu1 %v586_v37, %s1190_s6 }
 0x538   : > { %696 = vrot.lane.b32.xlu1 %v586_v37, %s1191_s13  ;;  %s892_s22 = spop %891 }
 0x539   : > { %v661_v49 = vstv %s892_s22 }
 0x53a   : > { %v662_v53 = vmul.f32 %v661_v49, %v645_v48 }
 0x53c   : > { %s894_s9 = spop %893 }
 0x53d   : > { %v674_v50 = vstv %s894_s9 }
 0x53e   : > { %v675_v54 = vmul.f32 %v674_v50, %v645_v48 }
 0x5a2   : > { %v687_v42 = vpop.permute.xlu1 %686 }
 0x5a3   : > { %690 = vst.msk [vmem:[%s1473_s23] sm:$0x1] %vm689_vm12, %v687_v42 }
 0x5a6   : > { %v692_v45 = vpop.permute.xlu1 %691 }
 0x5a7   : > { %695 = vst.msk [vmem:[%s1473_s23 - $0x1] sm:$0x2] %vm694_vm14, %v692_v45 }
 0x5aa   : > { %v697_v52 = vpop.permute.xlu1 %696 }
 0x5ab   : > { %700 = vst.msk [vmem:[%s1473_s23 - $0x2] sm:$0x4] %vm699_vm15, %v697_v52 }
 0x5ac   : > { %702 = vst.msk [vmem:[%s1473_s23] sm:$0x1] %vm701_vm0, %v634_v51 }
 0x5ad   : > { %704 = vst.msk [vmem:[%s1473_s23] sm:$0x1] %vm703_vm1, %v662_v53 }
 0x5ae   : > { %706 = vst.msk [vmem:[%s1473_s23] sm:$0x1] %vm705_vm2, %v675_v54 }
 0x5af   : > { %1113 = shalt.err (!%p1110_p2)
}
 0x5b0   : > { %s1114_s14 = scalar_lea.hbm %s1504_s30, 16  ;;  %s1118_s5 = scalar_lea.hbm %s1554_s4, 32 }
 0x5b1   : > { %p1115_p13 = scmp.ne.s32.totalorder %s1504_s30, %s1114_s14  ;;  %p1119_p9 = scmp.lt.u32.totalorder %s1504_s30, %s1554_s4 }
 0x5b2   : > { %p1120_p5 = scmp.lt.u32.totalorder %s1118_s5, %s1114_s14  ;;  %p1122_p4 = scmp.lt.u32.totalorder %s1114_s14, %s1504_s30 }
 0x5b3   : > { %p1116_p0 = pnand %p1115_p13, %p1578_p12 }
 0x5b4   : > { %p1121_p1 = por %p1120_p5, %p1119_p9 }
 0x5b5   : > { %p1117_p6 = pneg %p1116_p0 }
 0x5b6   : > { %p1123_p3 = por %p1122_p4, %p1121_p1 }
 0x5b8   : > { %p1124_p8 = pnand %p1123_p3, %p1117_p6 }
 0x5ba   : > { %1127 = shalt.err (!%p1124_p8)
}
 0x5bb   : > { %903 = dma.vmem_to_hbm [thread:$0]  (%p1578_p12), %s1506_s10, 16, %s1504_s30, %s708_s19  }
 0x5bc PF: > { %s732_s13 = sand.u32 1, %s1162_s15   ;;  %p1579_p10 = scmp.ne.s32.totalorder %s1566_s27, 0 }
 0x5bd   : > { %p1580_p11 = scmp.ge.s32.totalorder %s1174_s18, 2  ;;  %s733_s24 = scalar_lea.sflag [#allocation4], %s732_s13 }
 0x5bf   : > { %p919_p7 = pnand %p1580_p11, %p1579_p10 }
 0x5c1   : > { %1157 = dma.done.wait (!%p919_p7), %s733_s24, 16  }
 0x5c2   : > { %1159 = vsyncadd (!%p919_p7), %s733_s24, 4294967280  ;;  %s1581_s20 = sld [smem:[#allocation15_spill]]  ;;  %s1582_s17 = sld [smem:[#allocation16_spill]] }
 0x5c3   : > { %p23_p2 = scmp.ge.s32.totalorder %s1243_s21, 4   ;;  %s1583_s15 = smov %s1166_s16 }
 0x5c4   : > { %s1585_s18 = smov %s1243_s21 }
 0x5c5   :  { %25 = sbr.rel (!%p23_p2) target bundleno = 11 (0xb), region = 118 }
 0x5c8   : > { %s1584_s16 = smov %s1581_s20 }
 0x5cc   :  { %737 = vsyncpa [#allocation3], 1 }
 0x5cd   :  { %739 = vsyncpa [#allocation3 + $0x1], 1 }
 0x5ce   :  { %740 = vsyncpa [#allocation6], 1 }
 0x5cf   :  { %742 = vsyncpa [#allocation6 + $0x1], 1 }
 0x5d0   :  { %743 = vsyncpa [#allocation9], 1 }
 0x5d1   :  { %745 = vsyncpa [#allocation9 + $0x1], 1 }
 0x5d2   :  { %746 = vsyncpa [#allocation4], 1 }
 0x5d3   :  { %748 = vsyncpa [#allocation4 + $0x1], 1 }

// kernel: custom-call.22
= control target key start
LH: loop header
LB: loop body
LE: loop exit
PB: predicated region body
PF: predicated region fallthrough
CT: control target
= control target key end

     0   :  { %s1704_s30 = smov 0   ;;  %s1706_s10 = smov 0   ;;  %s2030_s0 = inlined_call_operand.vmem [shape: f32[2,2,2], index: 0, kind: input, shape index: {}]   ;;  %s2031_s1 = inlined_call_operand.vmem [shape: f32[2,2,2], index: 1, kind: input, shape index: {}]   ;;  %s2032_s2 = inlined_call_operand.vmem [shape: f32[2,2,2], index: 2, kind: input, shape index: {}]   ;;  %s2033_s3 = inlined_call_operand.vmem [shape: f32[2,2,2], index: 3, kind: input, shape index: {}]   ;;  %s2034_s4 = inlined_call_operand.vmem [shape: f32[2,2], index: 4, kind: output, shape index: {0}]   ;;  %s2035_s5 = inlined_call_operand.vmem [shape: f32[2,2], index: 5, kind: output, shape index: {1}]   ;;  %s2036_s6 = inlined_call_operand.vmem [shape: f32[2,2,2], index: 6, kind: output, shape index: {2}]   ;;  %s2037_s7 = inlined_call_operand.vmem [shape: f32[2,2,2], index: 7, kind: output, shape index: {3}]   ;;  %s2038_s8 = inlined_call_operand.vmem [shape: f32[2,2,2], index: 8, kind: output, shape index: {4}]   ;;  %s2039_s9 = inlined_call_operand.vmem [shape: f32[2,2,2], index: 9, kind: output, shape index: {5}]  }
   0x1   :  { %s1708_s11 = smov 0  }
   0x2 LB: > { %s1720_s12 = sadd.s32 4294967295, %s1641_s11   ;;  %s1723_s13 = sadd.s32 1, %s1641_s11   ;;  %s1641_s11 = sphi %s1708_s11, %s2058_s11   ;;  %s1637_s10 = sphi %s1706_s10, %s2057_s10   ;;  %s1633_s30 = sphi %s1704_s30, %s2056_s30  }
   0x3   : > { %s20_s14 = sshrl.u32 %s1641_s11, 3  ;;  %s21_s15 = sshrl.u32 %s1723_s13, 3 }
   0x4   : > { %s22_s16 = ssub.s32 %s20_s14, %s21_s15  ;;  %s25_s17 = sadd.s32 1, %s1637_s10 }
   0x5   : > { %p23_p0 = scmp.eq.s32.totalorder %s22_s16, 0  ;;  %p35_p1 = scmp.ne.s32.totalorder %s1637_s10, %s1633_s30 }
   0x6   : > { %p36_p2 = scmp.eq.s32.totalorder %s1720_s12, 1  ;;  %p1502_p4 = scmp.ge.s32.totalorder %s1641_s11, 2 }
   0x7   : > { %s1732_s18 = scalar_select %p23_p0, %s1637_s10, %s25_s17  }
   0x8   : > { %p1734_p3 = por %p36_p2, %p35_p1  ;;  %86 = sbr.rel (%p1502_p4) target bundleno = 17 (0x11), region = 16 }
   0x9   : > { %2040 = sst [smem:[#allocation33_spill]] %s1732_s18  ;;  %s88_s20 = sand.u32 (!%p1502_p4), 1, %s1641_s11  }
   0xa   : > { %s1504_s21 = sshll.u32 (!%p1502_p4), %s1641_s11, 1  ;;  %s1503_s22 = sshll.u32 (!%p1502_p4), %s88_s20, 1 }
   0xb   : > { %s92_s25 = scalar_lea.vmem (!%p1502_p4), %s2030_s0, %s1504_s21  ;;  %s90_s26 = scalar_lea.vmem (!%p1502_p4), [#allocation1], %s1503_s22 }
   0xc   : > { %v108_v0 = vld [vmem:[%s92_s25] sm:$0x3] (!%p1502_p4)  ;;  %s129_s29 = scalar_lea.vmem (!%p1502_p4), %s2031_s1, %s1504_s21  ;;  %s166_s16 = scalar_lea.vmem (!%p1502_p4), %s2032_s2, %s1504_s21 }
   0xd   : > { %109 = vst [vmem:[%s90_s26] sm:$0x3] (!%p1502_p4), %v108_v0  ;;  %v145_v1 = vld [vmem:[%s129_s29] sm:$0x3] (!%p1502_p4)  ;;  %s127_s17 = scalar_lea.vmem (!%p1502_p4), [#allocation3], %s1503_s22  ;;  %s203_s23 = scalar_lea.vmem (!%p1502_p4), %s2033_s3, %s1504_s21 }
   0xe   : > { %146 = vst [vmem:[%s127_s17] sm:$0x3] (!%p1502_p4), %v145_v1  ;;  %v182_v2 = vld [vmem:[%s166_s16] sm:$0x3] (!%p1502_p4)  ;;  %s164_s24 = scalar_lea.vmem (!%p1502_p4), [#allocation5], %s1503_s22  ;;  %s201_s25 = scalar_lea.vmem (!%p1502_p4), [#allocation7], %s1503_s22 }
   0xf   : > { %183 = vst [vmem:[%s164_s24] sm:$0x3] %v182_v2  ;;  %v219_v3 = vld [vmem:[%s203_s23] sm:$0x3] }
  0x10   : > { %220 = vst [vmem:[%s201_s25] sm:$0x3] %v219_v3 }
  0x11 PF: > { %p1511_p5 = scmp.ge.s32.totalorder %s1641_s11, 1  ;;  %p236_p6 = scmp.lt.s32.totalorder %s1641_s11, 3 }
  0x13   : > { %p237_p7 = pnand %p1511_p5, %p236_p6 }
  0x15   : > { %240 = sbr.rel (%p237_p7) target bundleno = 999 (0x3e7), region = 140 }
  0x1c   : > { %s259_s26 = sand.u32 1, %s1720_s12   ;;  %s277_s27 = sand.u32 1, %s1633_s30   ;;  %v337_v4 = vlaneseq  ;;  %v1651_v5 = vmov 0.0  }
  0x1d   : > { %s1757_s28 = sshll.u32 %s259_s26, 1  ;;  %s1759_s18 = sshll.u32 %s277_s27, 1  ;;  %332 = vst [vmem:[#allocation12] sm:$0xff] %v1651_v5  ;;  %333 = vst [vmem:[#allocation14] sm:$0xff] %v1651_v5 }
  0x1e   : > { %334 = vst [vmem:[#allocation16] sm:$0xff] %v1651_v5  ;;  %335 = vst [vmem:[#allocation18] sm:$0xff] %v1651_v5  ;;  %v1761_v6 = vand.u32 127, %v337_v4  ;;  %v1763_v7 = vshrl.u32 %v337_v4, 7  ;;  %s261_s11 = scalar_lea.vmem [#allocation1], %s1757_s28  ;;  %s265_s30 = scalar_lea.vmem [#allocation3], %s1757_s28 }
  0x1f   : > { %v304_v8 = vld [vmem:[%s261_s11] sm:$0x3]  ;;  %v308_v9 = vld [vmem:[%s265_s30] sm:$0x3]  ;;  %s269_s21 = scalar_lea.vmem [#allocation5], %s1757_s28  ;;  %s273_s22 = scalar_lea.vmem [#allocation7], %s1757_s28 }
  0x20   : > { %305 = vst [vmem:[#allocation0] sm:$0x3] %v304_v8  ;;  %309 = vst [vmem:[#allocation2] sm:$0x3] %v308_v9  ;;  %v312_v10 = vld [vmem:[%s269_s21] sm:$0x3]  ;;  %v339_v6 = vmov %v1761_v6  ;;  %v342_v7 = vmov %v1763_v7 }
  0x21   : > { %v316_v11 = vld [vmem:[%s273_s22] sm:$0x3]  ;;  %313 = vst [vmem:[#allocation4] sm:$0x3] %v312_v10  ;;  %v352_v6 = vmov %v1761_v6  ;;  %v355_v7 = vmov %v1763_v7  ;;  %s320_s29 = smov [#allocation20]  ;;  %s323_s14 = smov [#allocation21]  ;;  %vm346_vm0 = vcmp.eq.s32.totalorder %v342_v7, %v339_v6 }
  0x22   : > { %317 = vst [vmem:[#allocation6] sm:$0x3] %v316_v11  ;;  %vm359_vm1 = vcmp.eq.s32.totalorder %v355_v7, %v352_v6  ;;  %s336_s15 = smov [#allocation12]  ;;  %s349_s16 = smov [#allocation18]  ;;  %vm1391_vm2 = vcmp.lt.s32.totalorder %v1761_v6, 2  ;;  %v1383_v6 = vmov %v1761_v6  ;;  %v1386_v7 = vmov %v1763_v7 }
  0x23   : > { %s326_s17 = smov [#allocation22]  ;;  %s329_s20 = smov [#allocation23]  ;;  %vm1396_vm3 = vcmp.eq.s32.totalorder %v1386_v7, %v1383_v6  ;;  %v1434_v6 = vmov %v1761_v6  ;;  %v1403_v7 = vmov %v1763_v7 }
  0x24   : > { %v343_v12 = vld [vmem:[%s336_s15] sm:$0x3]  ;;  %s1387_s30 = smov [#allocation20]  ;;  %s1404_s21 = smov [#allocation21]  ;;  %v1400_v6 = vmov %v1761_v6  ;;  %v1437_v7 = vmov %v1763_v7 }
  0x25   : > { %v356_v13 = vld [vmem:[%s349_s16] sm:$0x3]  ;;  %v347_v16 = vsel %vm346_vm0, 1.0, %v343_v12  ;;  %s1421_s22 = smov [#allocation22]  ;;  %v1417_v6 = vmov %v1761_v6  ;;  %v1420_v7 = vmov %v1763_v7  ;;  %vm1447_vm4 = vcmp.eq.s32.totalorder %v1437_v7, %v1434_v6 }
  0x26   : > { %v360_v17 = vsel %vm359_vm1, 1.0, %v356_v13  ;;  %348 = vst [vmem:[%s336_s15] sm:$0x3] %v347_v16 }
  0x27   : > { %v321_v14 = vld [vmem:[#allocation0] sm:$0xff]  ;;  %v324_v15 = vld [vmem:[#allocation2] sm:$0xff]  ;;  %361 = vst [vmem:[%s349_s16] sm:$0x3] %v360_v17 }
  0x28   : > { %322 = vst [vmem:[%s320_s29] sm:$0xff] %v321_v14  ;;  %325 = vst [vmem:[%s323_s14] sm:$0xff] %v324_v15  ;;  %v327_v18 = vld [vmem:[#allocation4] sm:$0xff]  ;;  %s1438_s29 = smov [#allocation23] }
  0x29   : > { %v330_v19 = vld [vmem:[#allocation6] sm:$0xff]  ;;  %328 = vst [vmem:[%s326_s17] sm:$0xff] %v327_v18 }
  0x2a   : > { %331 = vst [vmem:[%s329_s20] sm:$0xff] %v330_v19 }
  0x2f   : > { %v1393_v20 = vld [vmem:[%s1387_s30] sm:$0x3] }
  0x30   : > { %v1410_v21 = vld [vmem:[%s1404_s21] sm:$0x3]  ;;  %v1394_v22 = vsel %vm1391_vm2, %v1393_v20, 0.0 }
  0x31   : > { %v1411_v23 = vsel %vm1391_vm2, %v1410_v21, 0.0  ;;  %v1427_v24 = vld [vmem:[%s1421_s22] sm:$0x3]  ;;  %v1395_v26 = vmul.f32 %v1394_v22, %v1394_v22 }
  0x32   : > { %v1444_v25 = vld [vmem:[%s1438_s29] sm:$0x3]  ;;  %v1412_v27 = vmul.f32 %v1411_v23, %v1411_v23  ;;  %v1428_v28 = vsel %vm1391_vm2, %v1427_v24, 0.0 }
  0x33   : > { %v1445_v29 = vsel %vm1391_vm2, %v1444_v25, 0.0  ;;  %v1429_v30 = vmul.f32 %v1428_v28, %v1428_v28  ;;  %v1397_v33 = vsel %vm1396_vm3, 0.0, %v1395_v26 }
  0x34   : > { %v1414_v31 = vadd.f32 %v1412_v27, %v1395_v26  ;;  %v1446_v32 = vmul.f32 %v1445_v29, %v1445_v29  ;;  %v1413_v34 = vadd.f32 %v1412_v27, %v1397_v33 }
  0x36   : > { %v1431_v35 = vadd.f32 %v1429_v30, %v1414_v31  ;;  %v1430_v36 = vadd.f32 %v1429_v30, %v1413_v34  ;;  %v1448_v37 = vsel %vm1447_vm4, 0.0, %v1446_v32 }
  0x38   : > { %v1450_v38 = vadd.f32 %v1446_v32, %v1431_v35  ;;  %v1449_v39 = vadd.f32 %v1448_v37, %v1430_v36 }
  0x3a   : > { %1451 = vadd.xlane.f32.xlu0 %v1450_v38 }
  0x3e   : > { %1459 = vadd.xlane.f32.xlu0 %v1449_v39 }
  0xc7   : > { %v1452_v40 = vpop.xlane.xlu0 %1451 }
  0xc8   : > { %v1453_v41 = vrot.slane %v1452_v40, 4 }
  0xca   : > { %v1454_v42 = vadd.f32 %v1453_v41, %v1452_v40 }
  0xcb   : > { %v1460_v43 = vpop.xlane.xlu0 %1459 }
  0xcc   : > { %v1455_v44 = vrot.slane %v1454_v42, 2  ;;  %v1461_v45 = vrot.slane %v1460_v43, 4 }
  0xce   : > { %v1462_v46 = vadd.f32 %v1461_v45, %v1460_v43  ;;  %v1456_v47 = vadd.f32 %v1455_v44, %v1454_v42 }
  0xd0   : > { %v1463_v48 = vrot.slane %v1462_v46, 2  ;;  %v1457_v50 = vrot.slane %v1456_v47, 1 }
  0xd2   : > { %v1464_v49 = vadd.f32 %v1463_v48, %v1462_v46  ;;  %v1458_v53 = vadd.f32 %v1457_v50, %v1456_v47 }
  0xd4   : > { %v1465_v51 = vrot.slane %v1464_v49, 1 }
  0xd6   : > { %v1466_v52 = vadd.f32 %v1465_v51, %v1464_v49 }
  0xd8   : > { %1552 = vpush %v1466_v52 }
  0xd9   : > { %1554 = vpush %v1458_v53 }
 0x109   : > { %s1553_s14 = spop %1552 }
 0x10a   : > { %s1555_s15 = spop %1554 }
 0x10b   : > { %s1469_s16 = smul.f32 1e-10, %s1555_s15 }
 0x10d   : > { %p1470_p8 = scmp.le.f32.partialorder %s1553_s14, %s1469_s16 }
 0x10e   : > { %s1797_s17 = smov (!%p1470_p8), 0  }
 0x10f   : > { %1473 = sbr.rel (%p1470_p8) target bundleno = 953 (0x3b9), region = 467 }
 0x116 LB: >> { %s1802_s20 = smov 0   ;;  %s1645_s17 = sphi %s1797_s17, %s2042_s17  }
 0x117 LB: >>> { %s466_s30 = smov [#allocation20]  ;;  %v470_v6 = vmov %v1761_v6  ;;  %v473_v7 = vmov %v1763_v7  ;;  %s486_s21 = smov [#allocation21]  ;;  %vm789_vm14 = vcmp.eq.s32.totalorder %v1763_v7, 0  ;;  %vm801_vm15 = vcmp.eq.s32.totalorder %v1763_v7, 1  ;;  %s1649_s20 = sphi %s1802_s20, %s465_s20  }
 0x118   : >>> { %v490_v6 = vmov %v1761_v6  ;;  %v493_v7 = vmov %v1763_v7  ;;  %v474_v54 = vld [vmem:[%s466_s30] sm:$0x3]  ;;  %vm477_vm5 = vcmp.eq.s32.totalorder %v473_v7, %v470_v6  ;;  %s506_s22 = smov [#allocation23]  ;;  %s467_s29 = smov [#allocation24] }
 0x119   : >>> { %vm497_vm6 = vcmp.eq.s32.totalorder %v493_v7, %v490_v6  ;;  %v510_v6 = vmov %v1761_v6  ;;  %v513_v7 = vmov %v1763_v7  ;;  %v478_v55 = vsel %vm477_vm5, %v474_v54, 0.0  ;;  %v494_v56 = vld [vmem:[%s486_s21] sm:$0x3]  ;;  %s487_s14 = smov [#allocation25]  ;;  %s507_s15 = smov [#allocation26] }
 0x11a   : >>> { %vm517_vm7 = vcmp.eq.s32.totalorder %v513_v7, %v510_v6  ;;  %v479_v57 = vrot.slane %v478_v55, 4  ;;  %v498_v58 = vsel %vm497_vm6, %v494_v56, 0.0  ;;  %v514_v59 = vld [vmem:[%s506_s22] sm:$0x3]  ;;  %s530_s16 = smov [#allocation25]  ;;  %s528_s30 = smov [#allocation24]  ;;  %v579_v6 = vmov %v1761_v6 }
 0x11b   : >>> { %v499_v60 = vrot.slane %v498_v58, 4  ;;  %v518_v61 = vsel %vm517_vm7, %v514_v59, 0.0  ;;  %s532_s21 = smov [#allocation26]  ;;  %s567_s22 = smov [#allocation27]  ;;  %v582_v7 = vmov %v1763_v7  ;;  %v594_v6 = vmov %v1761_v6 }
 0x11c   : >>> { %v480_v62 = vadd.f32 %v479_v57, %v478_v55  ;;  %v519_v63 = vrot.slane %v518_v61, 4  ;;  %v597_v7 = vmov %v1763_v7  ;;  %vm584_vm12 = vcmp.eq.s32.totalorder %v582_v7, %v579_v6  ;;  %s1821_s24 = smov [#allocation22]  ;;  %s1827_s23 = smov [#allocation14] }
 0x11d   : >>> { %v500_v0 = vadd.f32 %v499_v60, %v498_v58  ;;  %vm599_vm13 = vcmp.eq.s32.totalorder %v597_v7, %v594_v6  ;;  %s829_s11 = smov [#allocation31]  ;;  %s1833_s27 = smov [#allocation18]  ;;  %v615_v55 = vld [vmem:[%s1821_s24] sm:$0x3]  ;;  %v692_v6 = vmov %v1761_v6  ;;  %v695_v7 = vmov %v1763_v7 }
 0x11e   : >>> { %v481_v1 = vrot.slane %v480_v62, 2  ;;  %v520_v2 = vadd.f32 %v519_v63, %v518_v61  ;;  %v838_v58 = vld [vmem:[%s1827_s23] sm:$0x3]  ;;  %s607_s26 = smov [#allocation32]  ;;  %s831_s25 = smov [#allocation32]  ;;  %v706_v6 = vmov %v1761_v6  ;;  %v709_v7 = vmov %v1763_v7 }
 0x11f   : >>> { %v501_v3 = vrot.slane %v500_v0, 2  ;;  %v840_v61 = vld [vmem:[%s1833_s27] sm:$0x3]  ;;  %vm699_vm0 = vcmp.eq.s32.totalorder %v695_v7, %v692_v6  ;;  %v665_v6 = vmov %v1761_v6  ;;  %v668_v7 = vmov %v1763_v7  ;;  %s465_s20 = sadd.s32 1, %s1649_s20  }
 0x120   : >>> { %v482_v4 = vadd.f32 %v481_v1, %v480_v62  ;;  %v521_v5 = vrot.slane %v520_v2, 2  ;;  %v679_v6 = vmov %v1761_v6  ;;  %v682_v7 = vmov %v1763_v7  ;;  %p462_p9 = scmp.ge.s32.totalorder %s465_s20, 3  }
 0x121   : >>> { %v502_v8 = vadd.f32 %v501_v3, %v500_v0  ;;  %vm714_vm1 = vcmp.eq.s32.totalorder %v709_v7, %v706_v6  ;;  %vm673_vm3 = vcmp.eq.s32.totalorder %v668_v7, %v665_v6  ;;  %vm686_vm4 = vcmp.eq.s32.totalorder %v682_v7, %v679_v6 }
 0x122   : >>> { %v483_v9 = vrot.slane %v482_v4, 1  ;;  %v522_v10 = vadd.f32 %v521_v5, %v520_v2  ;;  %vm728_vm5 = vcmp.eq.s32.totalorder %v1761_v6, 0  ;;  %vm732_vm6 = vcmp.eq.s32.totalorder %v1761_v6, 1 }
 0x123   : >>> { %v503_v11 = vrot.slane %v502_v8, 1  ;;  %v366_v6 = vmov (%p462_p9), %v1761_v6  ;;  %v369_v7 = vmov (%p462_p9), %v1763_v7 }
 0x124   : >>> { %v484_v12 = vadd.f32 %v483_v9, %v482_v4  ;;  %v523_v13 = vrot.slane %v522_v10, 1  ;;  %v419_v6 = vmov (%p462_p9), %v1761_v6  ;;  %vm381_vm7 = vcmp.eq.s32.totalorder (%p462_p9), %v369_v7, %v366_v6 }
 0x125   : >>> { %v504_v14 = vadd.f32 %v503_v11, %v502_v8  ;;  %v422_v7 = vmov (%p462_p9), %v1763_v7  ;;  %v385_v6 = vmov (%p462_p9), %v1761_v6 }
 0x126   : >>> { %485 = vst [vmem:[%s467_s29] sm:$0x1] %v484_v12  ;;  %v524_v15 = vadd.f32 %v523_v13, %v522_v10  ;;  %s569_s29 = smov [#allocation28]  ;;  %v388_v7 = vmov (%p462_p9), %v1763_v7  ;;  %v402_v6 = vmov (%p462_p9), %v1761_v6 }
 0x127   : >>> { %505 = vst [vmem:[%s487_s14] sm:$0x1] %v504_v14  ;;  %s526_s14 = smov [#allocation29]  ;;  %v405_v7 = vmov (%p462_p9), %v1763_v7 }
 0x128   : >>> { %525 = vst [vmem:[%s507_s15] sm:$0x1] %v524_v15  ;;  %s527_s15 = smov [#allocation30]  ;;  %s571_s14 = smov %s526_s14 }
 0x129   : >>> { %s573_s15 = smov %s527_s15 }
 0x12d   : >>> { %v529_v18 = vld [vmem:[%s528_s30] sm:$0xff]  ;;  %s590_s30 = smov [#allocation30] }
 0x12e   : >>> { %v531_v16 = vld [vmem:[%s530_s16] sm:$0xff]  ;;  %v552_v31 = vand.u32 2147483647, %v529_v18  ;;  %s575_s16 = smov [#allocation29] }
 0x12f   : >>> { %v535_v17 = vmul.f32 2.0, %v531_v16  ;;  %v533_v19 = vld [vmem:[%s532_s21] sm:$0xff]  ;;  %v553_v36 = vand.u32 2147483647, %v531_v16  ;;  %s588_s21 = smov [#allocation31] }
 0x130   : >>> { %v534_v20 = vsub.f32 %v533_v19, %v529_v18  ;;  %v554_v32 = vand.u32 2147483647, %v533_v19 }
 0x131   : >>> { %1603 = vrcp.f32 %v535_v17 }
 0x132   : >>> { %v555_v35 = vmin.f32 %v552_v31, %v554_v32 }
 0x134   : >>> { %v556_v37 = vmul.f32 1.1920929e-08, %v555_v35 }
 0x136   : >>> { %vm557_vm11 = vcmp.le.f32.partialorder %v553_v36, %v556_v37 }
 0x13b   : >>> { %v1604_v21 = vpop.eup %1603 }
 0x13c   : >>> { %v537_v22 = vmul.f32 %v1604_v21, %v534_v20 }
 0x13e   : >>> { %v539_v23 = vmul.f32 %v537_v22, %v537_v22  ;;  %vm538_vm10 = vcmp.ge.f32.partialorder %v537_v22, 0.0 }
 0x140   : >>> { %v540_v24 = vadd.f32 1.0, %v539_v23 }
 0x142   : >>> { %1605 = vrsqrt.f32 %v540_v24  ;;  %vm543_vm8 = vcmp.eq.f32.partialorder %v540_v24, inf  ;;  %v546_v26 = vand.u32 2147483648, %v540_v24  ;;  %vm545_vm9 = vcmp.eq.f32.partialorder %v540_v24, 0.0 }
 0x14c   : >>> { %v1606_v25 = vpop.eup %1605 }
 0x14d   : >>> { %v542_v27 = vmul.f32 %v1606_v25, %v540_v24 }
 0x14f   : >>> { %v544_v28 = vsel %vm543_vm8, %v540_v24, %v542_v27  ;;  %vm434_vm8 = vcmp.eq.s32.totalorder (%p462_p9), %v422_v7, %v419_v6 }
 0x150   : >>> { %v547_v29 = vsel %vm545_vm9, %v546_v26, %v544_v28 }
 0x151   : >>> { %v548_v30 = vxor.u32 2147483648, %v547_v29 }
 0x153   : >>> { %v549_v33 = vsel %vm538_vm10, %v547_v29, %v548_v30 }
 0x154   : >>> { %v550_v34 = vadd.f32 %v549_v33, %v537_v22 }
 0x156   : >>> { %1607 = vrcp.f32 %v550_v34 }
 0x160   : >>> { %v1608_v38 = vpop.eup %1607 }
 0x161   : >>> { %v558_v39 = vsel %vm557_vm11, 0.0, %v1608_v38 }
 0x162   : >>> { %v559_v40 = vmul.f32 %v558_v39, %v558_v39  ;;  %v563_v41 = vmul.f32 %v558_v39, %v531_v16 }
 0x164   : >>> { %v560_v42 = vadd.f32 1.0, %v559_v40  ;;  %v564_v43 = vsub.f32 %v529_v18, %v563_v41  ;;  %v566_v44 = vadd.f32 %v563_v41, %v533_v19 }
 0x166   : >>> { %1609 = vrsqrt.f32 %v560_v42  ;;  %568 = vst [vmem:[%s567_s22] sm:$0xff] %v564_v43  ;;  %570 = vst [vmem:[%s569_s29] sm:$0xff] %v566_v44  ;;  %s605_s22 = smov [#allocation31]  ;;  %s1817_s29 = smov [#allocation20] }
 0x167   : >>> { %v613_v53 = vld [vmem:[%s1817_s29] sm:$0x3] }
 0x170   : >>> { %v1610_v45 = vpop.eup %1609 }
 0x171   : >>> { %572 = vst [vmem:[%s571_s14] sm:$0xff] %v1610_v45  ;;  %v562_v46 = vmul.f32 %v1610_v45, %v558_v39  ;;  %s603_s14 = smov [#allocation32] }
 0x173   : >>> { %574 = vst [vmem:[%s573_s15] sm:$0xff] %v562_v46  ;;  %s1819_s15 = smov [#allocation21] }
 0x174   : >>> { %v614_v54 = vld [vmem:[%s1819_s15] sm:$0x3] }
 0x178   : >>> { %v576_v47 = vld [vmem:[%s575_s16] ss:$0 sm:$0xff]  ;;  %s1823_s16 = smov [#allocation23] }
 0x179   : >>> { %v585_v48 = vsel %vm584_vm12, %v576_v47, 0.0  ;;  %v616_v56 = vld [vmem:[%s1823_s16] sm:$0x3] }
 0x17a   : >>> { %586 = vadd.xlane.f32.xlu0 %v585_v48  ;;  %v591_v49 = vld [vmem:[%s590_s30] ss:$0 sm:$0xff]  ;;  %s1825_s30 = smov [#allocation12] }
 0x17b   : >>> { %v600_v50 = vsel %vm599_vm13, %v591_v49, 0.0  ;;  %v837_v57 = vld [vmem:[%s1825_s30] sm:$0x3] }
 0x17e   : >>> { %601 = vadd.xlane.f32.xlu0 %v600_v50 }
 0x207   : >>> { %v587_v51 = vpop.xlane.xlu0 %586 }
 0x208   : >>> { %589 = vst [vmem:[%s588_s21] sm:$0xff] %v587_v51  ;;  %s1829_s21 = smov [#allocation16] }
 0x209   : >>> { %v839_v59 = vld [vmem:[%s1829_s21] sm:$0x3] }
 0x20b   : >>> { %v602_v52 = vpop.xlane.xlu0 %601 }
 0x20c   : >>> { %604 = vst [vmem:[%s603_s14] sm:$0xff] %v602_v52  ;;  %s1853_s14 = smov [#allocation23] }
 0x20f   : >>> { %v606_v60 = vld [vmem:[%s605_s22] sm:$0xff]  ;;  %s1851_s22 = smov [#allocation22] }
 0x210   : >>> { %v830_v62 = vld [vmem:[%s829_s11] sm:$0xff]  ;;  %v617_v63 = vmul.f32 %v613_v53, %v606_v60  ;;  %v620_v0 = vmul.f32 %v614_v54, %v606_v60  ;;  %v624_v1 = vmul.f32 %v615_v55, %v606_v60  ;;  %v627_v2 = vmul.f32 %v616_v56, %v606_v60  ;;  %s1849_s11 = smov [#allocation12] }
 0x211   : >>> { %v841_v3 = vmul.f32 %v837_v57, %v830_v62  ;;  %v844_v4 = vmul.f32 %v838_v58, %v830_v62  ;;  %v848_v5 = vmul.f32 %v839_v59, %v830_v62  ;;  %v851_v8 = vmul.f32 %v840_v61, %v830_v62 }
 0x213   : >>> { %v608_v9 = vld [vmem:[%s607_s26] sm:$0xff]  ;;  %s635_s26 = smov [#allocation30] }
 0x214   : >>> { %v832_v10 = vld [vmem:[%s831_s25] sm:$0xff]  ;;  %v618_v11 = vmul.f32 %v615_v55, %v608_v9  ;;  %v621_v12 = vmul.f32 %v616_v56, %v608_v9  ;;  %v623_v13 = vmul.f32 %v613_v53, %v608_v9  ;;  %v626_v14 = vmul.f32 %v614_v54, %v608_v9  ;;  %s633_s25 = smov [#allocation29] }
 0x215   : >>> { %v842_v15 = vmul.f32 %v839_v59, %v832_v10  ;;  %v845_v16 = vmul.f32 %v840_v61, %v832_v10  ;;  %v847_v17 = vmul.f32 %v837_v57, %v832_v10  ;;  %v850_v18 = vmul.f32 %v838_v58, %v832_v10  ;;  %v634_v27 = vld [vmem:[%s633_s25] ss:$0 sm:$0xff]  ;;  %s662_s25 = smov [#allocation27] }
 0x216   : >>> { %v619_v19 = vsub.f32 %v617_v63, %v618_v11  ;;  %v622_v20 = vsub.f32 %v620_v0, %v621_v12  ;;  %v625_v21 = vadd.f32 %v624_v1, %v623_v13  ;;  %v628_v22 = vadd.f32 %v627_v2, %v626_v14  ;;  %v636_v28 = vld [vmem:[%s635_s26] ss:$0 sm:$0xff]  ;;  %s661_s26 = smov [#allocation20] }
 0x217   : >>> { %v843_v23 = vsub.f32 %v841_v3, %v842_v15  ;;  %v846_v24 = vsub.f32 %v844_v4, %v845_v16  ;;  %v849_v25 = vadd.f32 %v848_v5, %v847_v17  ;;  %v852_v26 = vadd.f32 %v851_v8, %v850_v18  ;;  %v669_v63 = vld [vmem:[%s662_s25] ss:$0 sm:$0xff]  ;;  %s905_s25 = sadd.s32 (%p462_p9), 1, %s1645_s17  }
 0x218   : >>> { %630 = vst [vmem:[%s1819_s15] sm:$0x3] %v622_v20  ;;  %632 = vst [vmem:[%s1823_s16] sm:$0x3] %v628_v22  ;;  %s1855_s15 = smov [#allocation20]  ;;  %s703_s16 = smov [#allocation28] }
 0x219   : >>> { %629 = vst [vmem:[%s1817_s29] sm:$0x3] %v619_v19  ;;  %631 = vst [vmem:[%s1821_s24] sm:$0x3] %v625_v21  ;;  %s1857_s24 = smov [#allocation16]  ;;  %s1865_s29 = smov [#allocation21]  ;;  %v710_v59 = vld [vmem:[%s703_s16] ss:$0 sm:$0xff] }
 0x21a   : >>> { %853 = vst [vmem:[%s1825_s30] sm:$0x3] %v843_v23  ;;  %854 = vst [vmem:[%s1827_s23] sm:$0x3] %v846_v24  ;;  %s1859_s23 = smov [#allocation14]  ;;  %s689_s30 = smov [#allocation22] }
 0x21b   : >>> { %855 = vst [vmem:[%s1829_s21] sm:$0x3] %v849_v25  ;;  %856 = vst [vmem:[%s1833_s27] sm:$0x3] %v852_v26  ;;  %s1863_s27 = smov [#allocation18]  ;;  %s702_s21 = smov [#allocation23] }
 0x21c   : >>> { %s805_s16 = smov [#allocation21]  ;;  %p458_p10 = scmp.ge.s32.totalorder (%p462_p9), %s905_s25, 15 }
 0x21d   : >> { %s2042_s17 = smov (%p462_p9), %s905_s25 }
 0x21f   : >>> { %v644_v30 = vld [vmem:[%s1853_s14] sm:$0x3] }
 0x220   : >>> { %v643_v29 = vld [vmem:[%s1851_s22] sm:$0x3]  ;;  %v652_v36 = vmul.f32 %v644_v30, %v636_v28  ;;  %v655_v42 = vmul.f32 %v644_v30, %v634_v27 }
 0x221   : >>> { %v641_v31 = vld [vmem:[%s1855_s15] sm:$0x3]  ;;  %v651_v35 = vmul.f32 %v643_v29, %v634_v27  ;;  %v654_v37 = vmul.f32 %v643_v29, %v636_v28 }
 0x222   : >>> { %v859_v32 = vld [vmem:[%s1849_s11] ss:$0 sm:$0xff]  ;;  %v1531_v34 = vld [vmem:[%s1849_s11 + $0x1] ss:$0 sm:$0xff]  ;;  %v645_v48 = vmul.f32 %v641_v31, %v634_v27  ;;  %v648_v49 = vmul.f32 %v641_v31, %v636_v28 }
 0x223   : >>> { %v1530_v33 = vld [vmem:[%s1849_s11 - $0x1] sm:$0x2]  ;;  %v1533_v40 = vld [vmem:[%s1857_s24 + $0x1] sm:$0x1]  ;;  %v653_v47 = vsub.f32 %v651_v35, %v652_v36  ;;  %v656_v53 = vadd.f32 %v655_v42, %v654_v37 }
 0x224   : >>> { %v866_v38 = vsel %vm789_vm14, %v859_v32, %v1530_v33  ;;  %v870_v39 = vld [vmem:[%s1857_s24] ss:$0 sm:$0xff]  ;;  %v878_v43 = vsel %vm801_vm15, %v1531_v34, %v1533_v40  ;;  %v1535_v45 = vld [vmem:[%s1859_s23 + $0x1] ss:$0 sm:$0xff] }
 0x225   : >>> { %v883_v41 = vld [vmem:[%s1859_s23] ss:$0 sm:$0xff]  ;;  %869 = vst [vmem:[%s1849_s11] sm:$0x3] %v866_v38  ;;  %880 = vst [vmem:[%s1857_s24] sm:$0x3] %v878_v43  ;;  %v1537_v51 = vld [vmem:[%s1863_s27 + $0x1] sm:$0x1] }
 0x226   : >>> { %v1534_v44 = vld [vmem:[%s1859_s23 - $0x1] sm:$0x2]  ;;  %1532 = vst [vmem:[%s1849_s11 + $0x1] sm:$0x1] %v870_v39  ;;  %v902_v54 = vsel %vm801_vm15, %v1535_v45, %v1537_v51  ;;  %659 = vst [vmem:[%s1851_s22] sm:$0x3] %v653_v47  ;;  %s676_s11 = smov [#allocation21] }
 0x227   : >>> { %v894_v46 = vld [vmem:[%s1863_s27] ss:$0 sm:$0xff]  ;;  %v890_v50 = vsel %vm789_vm14, %v883_v41, %v1534_v44  ;;  %660 = vst [vmem:[%s1853_s14] sm:$0x3] %v656_v53  ;;  %s1907_s22 = smov [#allocation22]  ;;  %s1652_s14 = smov 1  }
 0x228   : >>> { %v642_v52 = vld [vmem:[%s1865_s29] sm:$0x3]  ;;  %893 = vst [vmem:[%s1859_s23] sm:$0x3] %v890_v50  ;;  %904 = vst [vmem:[%s1863_s27] sm:$0x3] %v902_v54  ;;  %s718_s24 = smov [#allocation21]  ;;  %s1910_s27 = smov [#allocation23] }
 0x229   : >>> { %v646_v55 = vmul.f32 %v642_v52, %v636_v28  ;;  %v649_v56 = vmul.f32 %v642_v52, %v634_v27  ;;  %1536 = vst [vmem:[%s1859_s23 + $0x1] sm:$0x1] %v894_v46  ;;  %s1653_s23 = smov 127  }
 0x22b   : >>> { %v647_v57 = vsub.f32 %v645_v48, %v646_v55  ;;  %v650_v58 = vadd.f32 %v649_v56, %v648_v49 }
 0x22d   : >>> { %657 = vst [vmem:[%s1855_s15] sm:$0x3] %v647_v57  ;;  %658 = vst [vmem:[%s1865_s29] sm:$0x3] %v650_v58  ;;  %v696_v60 = vld [vmem:[%s689_s30] sm:$0x3]  ;;  %s717_s15 = smov [#allocation20]  ;;  %s781_s29 = smov [#allocation20] }
 0x22e   : >>> { %v700_v61 = vsel %vm699_vm0, 0.0, %v696_v60  ;;  %v711_v62 = vld [vmem:[%s702_s21] sm:$0x3] }
 0x22f   : >>> { %701 = vst [vmem:[%s689_s30] sm:$0x3] %v700_v61  ;;  %v715_v0 = vsel %vm714_vm1, %v710_v59, %v711_v62  ;;  %s782_s30 = smov [#allocation22] }
 0x230   : >>> { %716 = vst [vmem:[%s702_s21] sm:$0x3] %v715_v0  ;;  %s806_s21 = smov [#allocation23] }
 0x234   : >>> { %v670_v1 = vld [vmem:[%s661_s26] sm:$0x3] }
 0x235   : >>> { %v683_v2 = vld [vmem:[%s676_s11] sm:$0x3]  ;;  %v674_v3 = vsel %vm673_vm3, %v669_v63, %v670_v1 }
 0x236   : >>> { %v687_v4 = vsel %vm686_vm4, 0.0, %v683_v2  ;;  %675 = vst [vmem:[%s661_s26] sm:$0x3] %v674_v3  ;;  %v755_v5 = vld [vmem:[%s1907_s22] sm:$0x3]  ;;  %s370_s26 = smov (%p462_p9), [#allocation20] }
 0x237   : >>> { %688 = vst [vmem:[%s676_s11] sm:$0x3] %v687_v4  ;;  %756 = vrot.lane.b32.xlu0 %v755_v5, %s1652_s14  ;;  %v751_v11 = vld [vmem:[%s1910_s27] sm:$0x3]  ;;  %s389_s11 = smov (%p462_p9), [#allocation21] }
 0x238   : >>> { %v772_v12 = vld [vmem:[%s1910_s27] sm:$0x3] }
 0x239   : >>> { %v754_v30 = vld [vmem:[%s1907_s22] sm:$0x3] }
 0x23d   : >>> { %v723_v8 = vld [vmem:[%s717_s15] sm:$0x3] }
 0x23e   : >>> { %724 = vrot.lane.b32.xlu1 %v723_v8, %s1652_s14  ;;  %v719_v9 = vld [vmem:[%s718_s24] sm:$0x3] }
 0x23f   : >>> { %v740_v10 = vld [vmem:[%s718_s24] sm:$0x3] }
 0x240   : >>> { %v722_v18 = vld [vmem:[%s717_s15] sm:$0x3] }
 0x242   : >>> { %720 = vrot.lane.b32.xlu1 %v719_v9, %s1652_s14 }
 0x246   : >>> { %741 = vrot.lane.b32.xlu1 %v740_v10, %s1653_s23 }
 0x24a   : >>> { %752 = vrot.lane.b32.xlu1 %v751_v11, %s1652_s14  ;;  %s423_s14 = smov (%p462_p9), [#allocation23] }
 0x24e   : >>> { %773 = vrot.lane.b32.xlu1 %v772_v12, %s1653_s23 }
 0x2a9   : >>> { %v757_v20 = vpop.permute.xlu0 %756 }
 0x2aa   : >>> { %v761_v22 = vsel %vm728_vm5, %v755_v5, %v757_v20 }
 0x2b0   : >>> { %v725_v13 = vpop.permute.xlu1 %724 }
 0x2b1   : >>> { %v729_v14 = vsel %vm728_vm5, %v723_v8, %v725_v13 }
 0x2b4   : >>> { %v721_v15 = vpop.permute.xlu1 %720 }
 0x2b5   : >>> { %v733_v16 = vsel %vm732_vm6, %v721_v15, %v729_v14 }
 0x2b6   : >>> { %v739_v17 = vsel %vm1391_vm2, %v733_v16, 0.0 }
 0x2b7   : >>> { %747 = vst [vmem:[%s717_s15] sm:$0x3] %v739_v17 }
 0x2b8   : >>> { %v742_v19 = vpop.permute.xlu1 %741 }
 0x2b9   : >>> { %v746_v21 = vsel %vm732_vm6, %v722_v18, %v742_v19 }
 0x2ba   : >>> { %748 = vst [vmem:[%s718_s24] sm:$0x3] %v746_v21 }
 0x2bc   : >>> { %v753_v23 = vpop.permute.xlu1 %752 }
 0x2bd   : >>> { %v765_v24 = vsel %vm732_vm6, %v753_v23, %v761_v22 }
 0x2be   : >>> { %v783_v25 = vld [vmem:[%s781_s29] ss:$0 sm:$0xff]  ;;  %v1523_v27 = vld [vmem:[%s781_s29 + $0x1] ss:$0 sm:$0xff]  ;;  %v771_v29 = vsel %vm1391_vm2, %v765_v24, 0.0 }
 0x2bf   : >>> { %v1522_v26 = vld [vmem:[%s781_s29 - $0x1] sm:$0x2]  ;;  %779 = vst [vmem:[%s1907_s22] sm:$0x3] %v771_v29  ;;  %s406_s22 = smov (%p462_p9), [#allocation22] }
 0x2c0   : >>> { %v790_v28 = vsel %vm789_vm14, %v783_v25, %v1522_v26  ;;  %v774_v31 = vpop.permute.xlu1 %773 }
 0x2c1   : >>> { %793 = vst [vmem:[%s781_s29] sm:$0x3] %v790_v28  ;;  %v807_v32 = vld [vmem:[%s805_s16] ss:$0 sm:$0xff]  ;;  %v1527_v34 = vld [vmem:[%s805_s16 + $0x1] ss:$0 sm:$0xff]  ;;  %v778_v35 = vsel %vm732_vm6, %v754_v30, %v774_v31 }
 0x2c2   : >>> { %v1526_v33 = vld [vmem:[%s805_s16 - $0x1] sm:$0x2]  ;;  %780 = vst [vmem:[%s1910_s27] sm:$0x3] %v778_v35 }
 0x2c3   : >>> { %v814_v36 = vsel %vm789_vm14, %v807_v32, %v1526_v33 }
 0x2c4   : >>> { %817 = vst [vmem:[%s805_s16] sm:$0x3] %v814_v36 }
 0x2c6   : >>> { %v794_v37 = vld [vmem:[%s782_s30] ss:$0 sm:$0xff]  ;;  %v1525_v38 = vld [vmem:[%s782_s30 + $0x1] sm:$0x1] }
 0x2c7   : >>> { %1524 = vst [vmem:[%s781_s29 + $0x1] sm:$0x1] %v794_v37  ;;  %v802_v39 = vsel %vm801_vm15, %v1523_v27, %v1525_v38  ;;  %464 = sbr.rel (!%p462_p9) target bundleno = 279 (0x117), region = 462 }
 0x2c8   : >>> { %804 = vst [vmem:[%s782_s30] sm:$0x3] %v802_v39 }
 0x2c9   : >>> { %v818_v40 = vld [vmem:[%s806_s21] ss:$0 sm:$0xff]  ;;  %v1529_v41 = vld [vmem:[%s806_s21 + $0x1] sm:$0x1] }
 0x2ca   : >>> { %1528 = vst [vmem:[%s805_s16 + $0x1] sm:$0x1] %v818_v40  ;;  %v826_v42 = vsel %vm801_vm15, %v1527_v34, %v1529_v41 }
 0x2cb   : >>> { %828 = vst [vmem:[%s806_s21] sm:$0x3] %v826_v42 }
 0x2ce   : >> { %v376_v43 = vld [vmem:[%s370_s26] sm:$0x3] }
 0x2cf   : >> { %v377_v45 = vsel %vm1391_vm2, %v376_v43, 0.0  ;;  %v412_v47 = vld [vmem:[%s406_s22] sm:$0x3] }
 0x2d0   : >> { %v378_v49 = vmul.f32 %v377_v45, %v377_v45  ;;  %v413_v51 = vsel %vm1391_vm2, %v412_v47, 0.0 }
 0x2d1   : >> { %v395_v44 = vld [vmem:[%s389_s11] sm:$0x3]  ;;  %v414_v53 = vmul.f32 %v413_v51, %v413_v51 }
 0x2d2   : >> { %v396_v46 = vsel %vm1391_vm2, %v395_v44, 0.0  ;;  %v429_v48 = vld [vmem:[%s423_s14] sm:$0x3]  ;;  %v382_v56 = vsel %vm381_vm7, 0.0, %v378_v49 }
 0x2d3   : >> { %v397_v50 = vmul.f32 %v396_v46, %v396_v46  ;;  %v430_v52 = vsel %vm1391_vm2, %v429_v48, 0.0 }
 0x2d4   : >> { %v431_v55 = vmul.f32 %v430_v52, %v430_v52 }
 0x2d5   : >> { %v399_v54 = vadd.f32 %v397_v50, %v378_v49  ;;  %v398_v57 = vadd.f32 %v397_v50, %v382_v56 }
 0x2d6   : >> { %v435_v60 = vsel %vm434_vm8, 0.0, %v431_v55 }
 0x2d7   : >> { %v416_v58 = vadd.f32 %v414_v53, %v399_v54  ;;  %v415_v59 = vadd.f32 %v414_v53, %v398_v57 }
 0x2d9   : >> { %v437_v61 = vadd.f32 %v431_v55, %v416_v58  ;;  %v436_v62 = vadd.f32 %v435_v60, %v415_v59 }
 0x2db   : >> { %438 = vadd.xlane.f32.xlu0 %v437_v61 }
 0x2df   : >> { %446 = vadd.xlane.f32.xlu0 %v436_v62 }
 0x368   : >> { %v439_v63 = vpop.xlane.xlu0 %438 }
 0x369   : >> { %v440_v0 = vrot.slane %v439_v63, 4 }
 0x36b   : >> { %v441_v1 = vadd.f32 %v440_v0, %v439_v63 }
 0x36c   : >> { %v447_v2 = vpop.xlane.xlu0 %446 }
 0x36d   : >> { %v442_v3 = vrot.slane %v441_v1, 2  ;;  %v448_v4 = vrot.slane %v447_v2, 4 }
 0x36f   : >> { %v449_v5 = vadd.f32 %v448_v4, %v447_v2  ;;  %v443_v8 = vadd.f32 %v442_v3, %v441_v1 }
 0x371   : >> { %v450_v9 = vrot.slane %v449_v5, 2  ;;  %v444_v11 = vrot.slane %v443_v8, 1 }
 0x373   : >> { %v451_v10 = vadd.f32 %v450_v9, %v449_v5  ;;  %v445_v14 = vadd.f32 %v444_v11, %v443_v8 }
 0x375   : >> { %v452_v12 = vrot.slane %v451_v10, 1 }
 0x377   : >> { %v453_v13 = vadd.f32 %v452_v12, %v451_v10 }
 0x379   : >> { %1556 = vpush %v453_v13 }
 0x37a   : >> { %1558 = vpush %v445_v14 }
 0x3aa   : >> { %s1557_s20 = spop %1556 }
 0x3ab   : >> { %s1559_s15 = spop %1558 }
 0x3ac   : >> { %s456_s24 = smul.f32 1e-10, %s1559_s15 }
 0x3ae   : >> { %p457_p11 = scmp.le.f32.partialorder %s1557_s20, %s456_s24 }
 0x3b0   : >> { %p459_p12 = por %p458_p10, %p457_p11 }
 0x3b2   : > { %907 = sbr.rel (!%p459_p12) target bundleno = 278 (0x116), region = 473 }
 0x3b9 PF: > { %s912_s23 = smov [#allocation20]  ;;  %v916_v6 = vmov %v1761_v6  ;;  %v919_v7 = vmov %v1763_v7  ;;  %v967_v15 = vld [vmem:[#allocation12] sm:$0x3]  ;;  %v973_v16 = vld [vmem:[#allocation14] sm:$0x3]  ;;  %s2043_s17 = scalar_lea.vmem [#allocation13], %s1757_s28 }
 0x3ba   : > { %v936_v6 = vmov %v1761_v6  ;;  %v939_v7 = vmov %v1763_v7  ;;  %v920_v17 = vld [vmem:[%s912_s23] sm:$0x3]  ;;  %vm923_vm9 = vcmp.eq.s32.totalorder %v919_v7, %v916_v6  ;;  %969 = vst [vmem:[%s2043_s17] sm:$0x3] %v967_v15  ;;  %s2044_s27 = scalar_lea.vmem [#allocation15], %s1757_s28  ;;  %s932_s29 = smov [#allocation23] }
 0x3bb   : > { %vm943_vm10 = vcmp.eq.s32.totalorder %v939_v7, %v936_v6  ;;  %975 = vst [vmem:[%s2044_s27] sm:$0x3] %v973_v16  ;;  %v979_v18 = vld [vmem:[#allocation16] sm:$0x3]  ;;  %v924_v19 = vsel %vm923_vm9, %v920_v17, 0.0  ;;  %s2045_s16 = scalar_lea.vmem [#allocation17], %s1757_s28  ;;  %s2046_s30 = scalar_lea.vmem [#allocation19], %s1757_s28 }
 0x3bc   : > { %981 = vst [vmem:[%s2045_s16] sm:$0x3] %v979_v18  ;;  %v985_v20 = vld [vmem:[#allocation18] sm:$0x3]  ;;  %v925_v21 = vrot.slane %v924_v19, 4  ;;  %v940_v22 = vld [vmem:[%s932_s29] sm:$0x3] }
 0x3bd   : > { %987 = vst [vmem:[%s2046_s30] sm:$0x3] %v985_v20  ;;  %v944_v23 = vsel %vm943_vm10, %v940_v22, 0.0  ;;  %s908_s21 = sand.u32 7, %s1720_s12   ;;  %s2047_s11 = scalar_lea.vmem [#allocation9], %s1759_s18 }
 0x3be   : > { %v926_v24 = vadd.f32 %v925_v21, %v924_v19  ;;  %v945_v25 = vrot.slane %v944_v23, 4  ;;  %s909_s25 = scalar_lea.vmem [#allocation8], %s908_s21  ;;  %s911_s26 = scalar_lea.vmem [#allocation10], %s908_s21 }
 0x3bf   : > { %s913_s25 = smov %s909_s25  ;;  %s933_s26 = smov %s911_s26 }
 0x3c0   : > { %v927_v26 = vrot.slane %v926_v24, 2  ;;  %v946_v6 = vadd.f32 %v945_v25, %v944_v23  ;;  %s2048_s22 = scalar_lea.vmem [#allocation11], %s1759_s18  ;;  %s1015_s14 = sshrl.u32 (%p1734_p3), %s1720_s12, 3 }
 0x3c1   : > { %s2049_s20 = scalar_lea.vmem (%p1734_p3), [#allocation9], %s1759_s18  ;;  %s1544_s15 = sshll.u32 (%p1734_p3), %s1015_s14, 1 }
 0x3c2   : > { %v928_v7 = vadd.f32 %v927_v26, %v926_v24  ;;  %v947_v27 = vrot.slane %v946_v6, 2  ;;  %s1017_s17 = scalar_lea.vmem (%p1734_p3), %s2034_s4, %s1544_s15 }
 0x3c4   : > { %v929_v28 = vrot.slane %v928_v7, 1  ;;  %v948_v29 = vadd.f32 %v947_v27, %v946_v6 }
 0x3c6   : > { %v930_v30 = vadd.f32 %v929_v28, %v928_v7  ;;  %v949_v31 = vrot.slane %v948_v29, 1 }
 0x3c8   : > { %931 = vst [vmem:[%s913_s25] sm:$0x1] %v930_v30  ;;  %v950_v32 = vadd.f32 %v949_v31, %v948_v29 }
 0x3ca   : > { %951 = vst [vmem:[%s933_s26] sm:$0x1] %v950_v32 }
 0x3cc   : > { %1014 = sbr.rel (!%p1734_p3) target bundleno = 985 (0x3d9), region = 158 }
 0x3cf   : > { %v955_v33 = vld [vmem:[#allocation8] sm:$0x3] }
 0x3d0   : > { %957 = vst [vmem:[%s2047_s11] sm:$0x3] %v955_v33 }
 0x3d1   : > { %v961_v34 = vld [vmem:[#allocation10] sm:$0x3] }
 0x3d2   : > { %963 = vst [vmem:[%s2048_s22] sm:$0x3] %v961_v34 }
 0x3d7   : > { %v1033_v35 = vld [vmem:[%s2049_s20] sm:$0x3] }
 0x3d8   : > { %1034 = vst [vmem:[%s1017_s17] sm:$0x3] %v1033_v35 }
 0x3d9 PF: > { %1051 = sbr.rel (!%p1734_p3) target bundleno = 993 (0x3e1), region = 192  ;;  %s1052_s27 = sshrl.u32 (%p1734_p3), %s1720_s12, 3 }
 0x3da   : > { %s2050_s29 = scalar_lea.vmem (%p1734_p3), [#allocation11], %s1759_s18  ;;  %s1545_s16 = sshll.u32 (%p1734_p3), %s1052_s27, 1 }
 0x3db   : > { %s1054_s25 = scalar_lea.vmem (%p1734_p3), %s2035_s5, %s1545_s16 }
 0x3df   : > { %v1070_v36 = vld [vmem:[%s2050_s29] sm:$0x3] (%p1734_p3) }
 0x3e0   : > { %1071 = vst [vmem:[%s1054_s25] sm:$0x3] %v1070_v36 }
 0x3e1 PF: > { %s1546_s26 = sshll.u32 %s1720_s12, 1  ;;  %s2051_s19 = scalar_lea.vmem [#allocation13], %s1757_s28 }
 0x3e2   : > { %v1103_v37 = vld [vmem:[%s2051_s19] sm:$0x3]  ;;  %s2052_s11 = scalar_lea.vmem [#allocation15], %s1757_s28  ;;  %s1087_s14 = scalar_lea.vmem %s2036_s6, %s1546_s26 }
 0x3e3   : > { %v1136_v38 = vld [vmem:[%s2052_s11] sm:$0x3]  ;;  %s1120_s24 = scalar_lea.vmem %s2037_s7, %s1546_s26  ;;  %s2053_s23 = scalar_lea.vmem [#allocation17], %s1757_s28  ;;  %1104 = vst [vmem:[%s1087_s14] sm:$0x3] %v1103_v37 }
 0x3e4   : > { %v1169_v39 = vld [vmem:[%s2053_s23] sm:$0x3]  ;;  %s2054_s17 = scalar_lea.vmem [#allocation19], %s1757_s28  ;;  %1137 = vst [vmem:[%s1120_s24] sm:$0x3] %v1136_v38  ;;  %s1153_s29 = scalar_lea.vmem %s2038_s8, %s1546_s26 }
 0x3e5   : > { %v1202_v40 = vld [vmem:[%s2054_s17] sm:$0x3]  ;;  %s1186_s21 = scalar_lea.vmem %s2039_s9, %s1546_s26  ;;  %1170 = vst [vmem:[%s1153_s29] sm:$0x3] %v1169_v39 }
 0x3e6   : > { %1203 = vst [vmem:[%s1186_s21] sm:$0x3] %v1202_v40 }
 0x3e7 PF: > { %s2055_s25 = sld [smem:[#allocation33_spill]]  ;;  %p13_p13 = scmp.ge.s32.totalorder %s1723_s13, 4  }
 0x3e8   : > { %s2056_s30 = smov %s1637_s10  ;;  %s2058_s11 = smov %s1723_s13 }
 0x3e9   :  { %15 = sbr.rel (!%p13_p13) target bundleno = 2 (0x2), region = 484 }
 0x3ed   : > { %s2057_s10 = smov %s2055_s25 }

// kernel: reverse
= control target key start
LH: loop header
LB: loop body
LE: loop exit
PB: predicated region body
PF: predicated region fallthrough
CT: control target
= control target key end

     0   :  { %v2_v0 = vlaneseq  ;;  %s105_s0 = inlined_call_operand.vmem [shape: f32[2,3], index: 0, kind: input, shape index: {}]   ;;  %s106_s1 = inlined_call_operand.vmem [shape: f32[2,3], index: 1, kind: output, shape index: {}]  }
   0x2   :  { %v3_v1 = vsub.s32 2, %v2_v0 }
   0x4   :  { %4 = vset.pattern.permute.xlu0 %v3_v1 }
   0x5   :  { %v20_v2 = vld [vmem:[%s105_s0] sm:$0x3] }
   0x6   :  { %21 = vst [vmem:[#allocation1] sm:$0x3] %v20_v2 }
   0xd   :  { %v38_v3 = vld [vmem:[#allocation1] sm:$0x3] }
   0xe   :  { %39 = vst [vmem:[#allocation0] sm:$0x3] %v38_v3 }
  0x15   :  { %v40_v4 = vld [vmem:[#allocation0] sm:$0xff] }
  0x16   :  { %41 = vperm.xlu0 %4, %v40_v4  }
  0x95   :  { %v42_v5 = vpop.permute.xlu0 %41 }
  0x96   :  { %43 = vst [vmem:[#allocation2] sm:$0xff] %v42_v5 }
  0x9d   :  { %v47_v6 = vld [vmem:[#allocation2] sm:$0x3] }
  0x9e   :  { %49 = vst [vmem:[#allocation3] sm:$0x3] %v47_v6 }
  0xa5   :  { %v65_v7 = vld [vmem:[#allocation3] sm:$0x3] }
  0xa6   :  { %66 = vst [vmem:[%s106_s1] sm:$0x3] %v65_v7 }

// kernel: custom-call.16
= control target key start
LH: loop header
LB: loop body
LE: loop exit
PB: predicated region body
PF: predicated region fallthrough
CT: control target
= control target key end

     0   :  { %s653_s9 = smov 0   ;;  %s655_s10 = smov 0   ;;  %s799_s0 = inlined_call_operand.vmem [shape: f32[2,3,3], index: 0, kind: input, shape index: {}]   ;;  %s800_s1 = inlined_call_operand.vmem [shape: f32[2,3,3], index: 1, kind: output, shape index: {0}]   ;;  %s801_s2 = inlined_call_operand.vmem [shape: f32[2,3], index: 2, kind: output, shape index: {1}]  }
   0x1   :  { %s657_s11 = smov 0   ;;  %s659_s12 = smov 0  }
   0x2   :  { %s661_s13 = smov 0  }
   0x3 LB: > { %s28_s14 = sadd.s32 1, %s626_s12  ;;  %s508_s15 = sadd.s32 4294967295, %s630_s13   ;;  %s630_s13 = sphi %s661_s13, %s9_s13   ;;  %s626_s12 = sphi %s659_s12, %s808_s12   ;;  %s622_s11 = sphi %s657_s11, %s807_s11   ;;  %s618_s10 = sphi %s655_s10, %s806_s10   ;;  %s614_s9 = sphi %s653_s9, %s805_s9  }
   0x4   : > { %p30_p0 = scmp.ge.s32.totalorder %s28_s14, 2  ;;  %s33_s16 = ssub.s32 0, %s626_s12 }
   0x5   : > { %s510_s17 = smin.u32 %s626_s12, %s33_s16  ;;  %p57_p1 = scmp.ne.s32.totalorder %s618_s10, %s614_s9 }
   0x6   : > { %s810_s14 = smov (%p30_p0, %s28_s14), 0  ;;  %s35_s18 = sshrl.u32 %s510_s17, 3 }
   0x7   : > { %s39_s19 = ssub.s32 0, %s810_s14  ;;  %p58_p2 = scmp.eq.s32.totalorder %s508_s15, 1 }
   0x8   : > { %s511_s20 = smin.u32 %s39_s19, %s810_s14  ;;  %s47_s24 = sadd.s32 1, %s618_s10 }
   0x9   : > { %s41_s21 = sshrl.u32 %s511_s20, 3  ;;  %p688_p3 = por %p58_p2, %p57_p1 }
   0xa   : > { %s44_s23 = ssub.s32 %s35_s18, %s41_s21  ;;  %p513_p5 = scmp.ge.s32.totalorder %s630_s13, 2 }
   0xb   : > { %p45_p4 = scmp.eq.s32.totalorder %s44_s23, 0  ;;  %s82_s26 = sand.u32 (!%p513_p5), 1, %s630_s13  }
   0xc   : > { %80 = sbr.rel (%p513_p5) target bundleno = 19 (0x13), region = 16  ;;  %s515_s27 = sshll.u32 (!%p513_p5), %s626_s12, 2 }
   0xd   : > { %s694_s25 = scalar_select %p45_p4, %s618_s10, %s47_s24  }
   0xe   : > { %s514_s28 = sshll.u32 (!%p513_p5), %s82_s26, 2  ;;  %s88_s3 = scalar_lea.vmem (!%p513_p5), %s799_s0, %s515_s27 }
   0xf   : > { %v104_v0 = vld [vmem:[%s88_s3] sm:$0xf] (!%p513_p5)  ;;  %s84_s4 = scalar_lea.vmem (!%p513_p5), [#allocation1], %s514_s28 }
  0x10   : > { %105 = vst [vmem:[%s84_s4] sm:$0xf] (!%p513_p5), %v104_v0 }
  0x13 PF: > { %p516_p6 = scmp.ge.s32.totalorder %s630_s13, 1  ;;  %p121_p7 = scmp.lt.s32.totalorder %s630_s13, 3 }
  0x15   : > { %p122_p8 = pnand %p516_p6, %p121_p7 }
  0x17   : > { %125 = sbr.rel (%p122_p8) target bundleno = 346 (0x15a), region = 50 }
  0x1e   : > { %s132_s5 = sand.u32 1, %s508_s15   ;;  %s142_s6 = sand.u32 1, %s614_s9   ;;  %v636_v2 = vmov 0.0  }
  0x1f   : > { %s517_s7 = sshll.u32 %s132_s5, 2  ;;  %s705_s8 = sshll.u32 %s142_s6, 1 }
  0x20   : > { %s134_s16 = scalar_lea.vmem [#allocation1], %s517_s7  ;;  %s155_s17 = sand.u32 7, %s622_s11  }
  0x21   : > { %v147_v1 = vld [vmem:[%s134_s16] sm:$0xf]  ;;  %s708_s18 = scalar_lea.vmem [#allocation4], %s155_s17  ;;  %s711_s19 = scalar_lea.vmem [#allocation3], %s517_s7 }
  0x22   : > { %148 = vst [vmem:[#allocation0] sm:$0xf] %v147_v1  ;;  %159 = vst [vmem:[%s708_s18] sm:$0x1] %v636_v2  ;;  %s144_s15 = scalar_lea.vmem [#allocation5], %s705_s8  ;;  %s714_s20 = smov 0  }
  0x29   : > { %v157_v3 = vld [vmem:[#allocation0] sm:$0xff] }
  0x2a   : > { %158 = vst [vmem:[#allocation2] sm:$0xff] %v157_v3 }
  0x2b LB: >> { %v167_v4 = vlaneseq  ;;  %v723_v6 = vstv %s634_s20  ;;  %s194_s9 = scalar_lea.vmem [#allocation2], %s634_s20  ;;  %s230_s21 = smov [#allocation2]  ;;  %v637_v60 = vmov 1.0   ;;  %v265_v61 = vld [vmem:[%s708_s18] ss:$0 sm:$0xff]  ;;  %s634_s20 = sphi %s714_s20, %s165_s20  }
  0x2c   : >> { %s252_s23 = scalar_lea.vmem [#allocation6], %s634_s20  ;;  %s268_s24 = smov [#allocation2] }
  0x2d   : >> { %v720_v5 = vshrl.u32 %v167_v4, 7  ;;  %v246_v49 = vand.u32 127, %v167_v4  ;;  %s269_s26 = smov [#allocation6] }
  0x2f   : >> { %vm171_vm0 = vcmp.gt.s32.totalorder %v720_v5, %v723_v6  ;;  %vm172_vm1 = vcmp.lt.s32.totalorder %v720_v5, 3  ;;  %v233_v5 = vmov %v720_v5  ;;  %vm738_vm12 = vcmp.eq.s32.totalorder %v246_v49, %v723_v6 }
  0x30   : >> { %vm173_vm2 = vmand %vm171_vm0, %vm172_vm1  ;;  %vm237_vm9 = vcmp.gt.s32.totalorder %v233_v5, %v723_v6  ;;  %vm238_vm10 = vcmp.lt.s32.totalorder %v233_v5, 3  ;;  %v272_v5 = vmov %v720_v5  ;;  %vm298_vm15 = vcmp.gt.s32.totalorder %v246_v49, %v723_v6 }
  0x31   : >> { %v166_v7 = vld [vmem:[#allocation2] sm:$0xff]  ;;  %v195_v16 = vld [vmem:[%s194_s9] ss:$0 sm:$0xff]  ;;  %vm239_vm11 = vmand %vm237_vm9, %vm238_vm10  ;;  %vm277_vm13 = vcmp.lt.s32.totalorder %v272_v5, 3  ;;  %v289_v5 = vmov %v720_v5 }
  0x32   : >> { %v174_v8 = vsel %vm173_vm2, %v166_v7, 0.0  ;;  %v196_v17 = vand.u32 2147483647, %v195_v16  ;;  %vm221_vm8 = vcmp.lt.f32.partialorder %v195_v16, 0.0  ;;  %v234_v46 = vld [vmem:[%s230_s21] sm:$0xff]  ;;  %vm306_vm14 = vcmp.ge.s32.totalorder %v289_v5, %v723_v6 }
  0x33   : >> { %v175_v9 = vmul.f32 %v174_v8, %v174_v8  ;;  %v240_v50 = vsel %vm239_vm11, %v234_v46, 0.0  ;;  %v275_v0 = vld [vmem:[%s268_s24] sm:$0xff]  ;;  %s285_s24 = smov %s268_s24  ;;  %vm307_vm0 = vmand %vm738_vm12, %vm306_vm14 }
  0x34   : >> { %v197_v22 = vmax.f32 %v196_v17, 0.0  ;;  %s310_s27 = scalar_lea.vmem %s285_s24, %s634_s20  ;;  %s165_s20 = sadd.s32 1, %s634_s20  }
  0x35   : >> { %v176_v10 = vrot.slane %v175_v9, 4  ;;  %p162_p9 = scmp.ge.s32.totalorder %s165_s20, 3  }
  0x36   : > { %s523_s28 = sshll.u32 (%p162_p9), %s622_s11, 2 }
  0x37   : >> { %v177_v11 = vadd.f32 %v176_v10, %v175_v9  ;;  %s341_s3 = scalar_lea.vmem (%p162_p9), %s800_s1, %s523_s28 }
  0x39   : >> { %v178_v12 = vrot.slane %v177_v11, 2 }
  0x3b   : >> { %v179_v13 = vadd.f32 %v178_v12, %v177_v11 }
  0x3d   : >> { %v180_v14 = vrot.slane %v179_v13, 1 }
  0x3f   : >> { %v181_v15 = vadd.f32 %v180_v14, %v179_v13  ;;  %v296_v14 = vld [vmem:[%s285_s24] sm:$0xff] }
  0x41   : >> { %578 = vrsqrt.f32 %v181_v15  ;;  %vm184_vm3 = vcmp.eq.f32.partialorder %v181_v15, inf  ;;  %v187_v19 = vand.u32 2147483648, %v181_v15  ;;  %vm186_vm4 = vcmp.eq.f32.partialorder %v181_v15, 0.0 }
  0x4b   : >> { %v579_v18 = vpop.eup %578 }
  0x4c   : >> { %v183_v20 = vmul.f32 %v579_v18, %v181_v15 }
  0x4e   : >> { %v185_v21 = vsel %vm184_vm3, %v181_v15, %v183_v20 }
  0x4f   : >> { %v188_v23 = vsel %vm186_vm4, %v187_v19, %v185_v21 }
  0x50   : >> { %v198_v24 = vand.u32 2147483647, %v188_v23 }
  0x52   : >> { %v199_v25 = vmax.f32 %v197_v22, %v198_v24 }
  0x54   : >> { %580 = vrcp.f32 %v199_v25  ;;  %vm211_vm7 = vcmp.eq.f32.partialorder %v199_v25, 0.0 }
  0x5e   : >> { %v581_v26 = vpop.eup %580 }
  0x5f   : >> { %v201_v27 = vmul.f32 %v581_v26, %v196_v17  ;;  %v204_v28 = vmul.f32 0.0, %v581_v26  ;;  %v208_v29 = vmul.f32 %v581_v26, %v198_v24 }
  0x61   : >> { %v202_v30 = vmul.f32 %v201_v27, %v201_v27  ;;  %v205_v31 = vmul.f32 %v204_v28, %v204_v28  ;;  %v209_v32 = vmul.f32 %v208_v29, %v208_v29 }
  0x63   : >> { %v206_v33 = vadd.f32 %v205_v31, %v202_v30 }
  0x65   : >> { %v210_v34 = vadd.f32 %v209_v32, %v206_v33 }
  0x67   : >> { %582 = vrsqrt.f32 %v210_v34  ;;  %vm214_vm5 = vcmp.eq.f32.partialorder %v210_v34, inf  ;;  %v217_v36 = vand.u32 2147483648, %v210_v34  ;;  %vm216_vm6 = vcmp.eq.f32.partialorder %v210_v34, 0.0 }
  0x71   : >> { %v583_v35 = vpop.eup %582 }
  0x72   : >> { %v213_v37 = vmul.f32 %v583_v35, %v210_v34 }
  0x74   : >> { %v215_v38 = vsel %vm214_vm5, %v210_v34, %v213_v37 }
  0x75   : >> { %v218_v39 = vsel %vm216_vm6, %v217_v36, %v215_v38 }
  0x76   : >> { %v219_v40 = vmul.f32 %v218_v39, %v199_v25 }
  0x78   : >> { %v220_v41 = vsel %vm211_vm7, 0.0, %v219_v40 }
  0x79   : >> { %v222_v42 = vxor.u32 2147483648, %v220_v41 }
  0x7b   : >> { %v223_v43 = vsel %vm221_vm8, %v220_v41, %v222_v42 }
  0x7c   : >> { %v731_v44 = vsel %vm186_vm4, %v195_v16, %v223_v43  ;;  %584 = vrcp.f32 %v223_v43  ;;  %v224_v47 = vsub.f32 %v223_v43, %v195_v16 }
  0x7d   : >> { %v229_v45 = vsub.f32 %v195_v16, %v731_v44 }
  0x7f   : >> { %586 = vrcp.f32 %v229_v45 }
  0x86   : >> { %v585_v48 = vpop.eup %584 }
  0x87   : >> { %v226_v51 = vmul.f32 %v585_v48, %v224_v47 }
  0x89   : >> { %v587_v52 = vpop.eup %586  ;;  %v228_v56 = vsel %vm186_vm4, 0.0, %v226_v51 }
  0x8a   : >> { %v242_v53 = vmul.f32 %v587_v52, %v240_v50  ;;  %v258_v58 = vsel %vm738_vm12, %v228_v56, 0.0 }
  0x8c   : >> { %v243_v55 = vsel %vm186_vm4, 0.0, %v242_v53 }
  0x8d   : >> { %v248_v57 = vsel %vm738_vm12, %v243_v55, 0.0 }
  0x8e   : >> { %249 = vadd.xlane.f32.xlu0 %v248_v57 }
  0x92   : >> { %259 = vadd.xlane.f32.xlu0 %v258_v58 }
 0x11b   : >> { %v250_v59 = vpop.xlane.xlu0 %249 }
 0x11c   : >> { %251 = vst [vmem:[#allocation6] sm:$0xff] %v250_v59 }
 0x11d   : >> { %253 = vst [vmem:[%s252_s23] sm:$0x1] %v637_v60 }
 0x11f   : >> { %v260_v62 = vpop.xlane.xlu0 %259 }
 0x120   : >> { %v266_v63 = vsel %vm738_vm12, %v260_v62, %v265_v61 }
 0x121   : >> { %267 = vst [vmem:[%s708_s18] sm:$0x1] %v266_v63 }
 0x124   : >> { %v274_v1 = vld [vmem:[%s269_s26] sm:$0xff]  ;;  %s286_s26 = smov %s269_s26 }
 0x125   : >> { %v276_v2 = vmul.f32 %v275_v0, %v274_v1  ;;  %v294_v13 = vld [vmem:[%s286_s26] sm:$0xff] }
 0x127   : >> { %v278_v3 = vsel %vm277_vm13, %v276_v2, 0.0 }
 0x128   : >> { %v279_v4 = vrot.slane %v278_v3, 4  ;;  %v327_v6 = vld [vmem:[#allocation4] sm:$0x3] (%p162_p9) }
 0x129   : > { %329 = vst [vmem:[%s144_s15] sm:$0x3] (%p162_p9), %v327_v6 }
 0x12a   : >> { %v280_v7 = vadd.f32 %v279_v4, %v278_v3 }
 0x12c   : >> { %v281_v8 = vrot.slane %v280_v7, 2 }
 0x12e   : >> { %v282_v9 = vadd.f32 %v281_v8, %v280_v7 }
 0x130   : >> { %v283_v10 = vrot.slane %v282_v9, 1 }
 0x132   : >> { %v284_v11 = vadd.f32 %v283_v10, %v282_v9 }
 0x134   : >> { %v290_v12 = vmul.f32 %v284_v11, %v260_v62 }
 0x136   : >> { %v295_v15 = vmul.f32 %v294_v13, %v290_v12 }
 0x138   : >> { %v299_v16 = vsub.f32 %v296_v14, %v295_v15 }
 0x13a   : >> { %v300_v17 = vsel %vm298_vm15, %v299_v16, %v296_v14 }
 0x13b   : >> { %v308_v18 = vsel %vm307_vm0, %v294_v13, %v300_v17 }
 0x13c   : >> { %309 = vst [vmem:[%s285_s24] sm:$0xff] %v308_v18 }
 0x13f   : > { %164 = sbr.rel (!%p162_p9) target bundleno = 43 (0x2b), region = 167 }
 0x143   : >> { %v311_v19 = vld [vmem:[%s310_s27] ss:$0 sm:$0xff] }
 0x144   : >> { %v316_v20 = vsel %vm738_vm12, %v731_v44, %v311_v19 }
 0x145   : >> { %317 = vst [vmem:[%s310_s27] sm:$0x1] %v316_v20 }
 0x146   : > { %p376_p10 = scmp.lt.s32.totalorder (%p688_p3), %s622_s11, 0  ;;  %s377_s4 = ssub.s32 (%p688_p3), 0, %s622_s11  ;;  %v399_v22 = vld [vmem:[%s144_s15] sm:$0x3] (%p688_p3) }
 0x147   : > { %s524_s5 = smin.u32 (%p688_p3), %s622_s11, %s377_s4 }
 0x148   : > { %s379_s6 = sshrl.u32 (%p688_p3), %s524_s5, 3 }
 0x149   : > { %s380_s7 = ssub.s32 (%p688_p3), 0, %s379_s6 }
 0x14c   : > { %v321_v5 = vld [vmem:[#allocation2] sm:$0xf] }
 0x14d   : > { %323 = vst [vmem:[%s711_s19] sm:$0xf] %v321_v5 }
 0x14f   : > { %375 = sbr.rel (!%p688_p3) target bundleno = 346 (0x15a), region = 91 }
 0x154   : > { %v357_v21 = vld [vmem:[%s711_s19] sm:$0xf] }
 0x155   : > { %358 = vst [vmem:[%s341_s3] sm:$0xf] %v357_v21 }
 0x156   : > { %s812_s7 = smov (!%p376_p10, %s380_s7), %s379_s6 }
 0x157   : > { %s525_s16 = sshll.u32 %s812_s7, 1 }
 0x158   : > { %s383_s19 = scalar_lea.vmem %s801_s2, %s525_s16 }
 0x159   : > { %400 = vst [vmem:[%s383_s19] sm:$0x3] %v399_v22 }
 0x15a PF: > { %s9_s13 = sadd.s32 1, %s630_s13   ;;  %s805_s9 = smov %s618_s10 }
 0x15b   : > { %p6_p11 = scmp.ge.s32.totalorder %s9_s13, 4   ;;  %s806_s10 = smov %s694_s25 }
 0x15c   : > { %s807_s11 = smov %s626_s12  ;;  %s808_s12 = smov %s810_s14 }
 0x15d   :  { %8 = sbr.rel (!%p6_p11) target bundleno = 3 (0x3), region = 178 }

</bundles_post_ra>
